<compile_context>
chip_gen: v7x
topology: tpu7x:2x2x1
jax: 0.10.0
libtpu: 0.0.40
codegen_flags: <defaults>
</compile_context>

<pallas_src>
import jax
import jax.numpy as jnp
from jax.experimental import pallas as pl
from jax.experimental.pallas import tpu as pltpu

NUM_SENSORS = 7
K_PAD = 8                      # layer-1 contraction dim padded 7 -> 8
H1, H2, H3 = 512, 1024, 512
LN_EPS = 1e-5


def _layernorm(h, out_dtype):
    """Affine-free LayerNorm (gamma/beta are folded into the next Linear).

    Single-pass statistics (var = E[h^2] - mu^2) in f32; the final scale is
    emitted directly in `out_dtype` so the bf16 downcast feeding the next MXU
    matmul is fused into this pass instead of a separate VPU sweep.
    NOTE: single-pass variance can differ slightly from PyTorch's two-pass
    LayerNorm when |mu| >> sigma; the clamp only guards against NaN.
    """
    inv_n = 1.0 / h.shape[-1]
    mu = jnp.sum(h, axis=-1, keepdims=True) * inv_n
    ms = jnp.sum(h * h, axis=-1, keepdims=True) * inv_n
    var = jnp.maximum(ms - mu * mu, 0.0)
    return ((h - mu) * jax.lax.rsqrt(var + LN_EPS)).astype(out_dtype)


def wavelength_predictor_kernel(
    x_ref,
    w1_ref, b1_ref,
    w2_ref, b2_ref,
    w3_ref, b3_ref,
    w4_ref, b4_ref,
    o_ref,
):
    x = x_ref[...]                                     # (TM, 8) f32, last lane 0

    # Block 1: Linear(7->512) as a single K=8 MXU matmul, + ReLU + LN.
    h = jnp.dot(x, w1_ref[...], preferred_element_type=jnp.float32) + b1_ref[...]
    h = jnp.maximum(h, 0.0)
    h = _layernorm(h, jnp.bfloat16)

    # Block 2: Linear(512->1024), bf16 weights / f32 MXU accumulation, + ReLU + LN.
    h = jnp.dot(h, w2_ref[...], preferred_element_type=jnp.float32) + b2_ref[...]
    h = jnp.maximum(h, 0.0)
    h = _layernorm(h, jnp.bfloat16)

    # Block 3: Linear(1024->512), bf16 weights / f32 MXU accumulation, + ReLU + LN.
    h = jnp.dot(h, w3_ref[...], preferred_element_type=jnp.float32) + b3_ref[...]
    h = jnp.maximum(h, 0.0)
    h = _layernorm(h, jnp.float32)

    # Head: Linear(512->1) as a lane-reduce (XLU has slack; an N=1 MXU matmul
    # would waste the systolic array).
    out = jnp.sum(h * w4_ref[...], axis=-1, keepdims=True) + b4_ref[...]
    # NOTE: (TM, 1) output block -> lane-sparse masked stores; a lane-dense
    # (1, TM) layout would need an in-kernel sublane->lane relayout for a ~few %
    # win on a tiny output, so it is intentionally left as-is (compile safety).
    o_ref[...] = out.astype(o_ref.dtype)


def init_raw_params(key):
    """PyTorch-equivalent parameters; weights stored as [in_features, out_features]."""
    ks = jax.random.split(key, 11)
    s = 0.02

    def lin(kw, kb, fi, fo):
        w = s * jax.random.normal(kw, (fi, fo), jnp.float32)
        b = 0.01 * jax.random.normal(kb, (1, fo), jnp.float32)
        return w, b

    w1, b1 = lin(ks[0], ks[1], NUM_SENSORS, H1)
    w2, b2 = lin(ks[2], ks[3], H1, H2)
    w3, b3 = lin(ks[4], ks[5], H2, H3)
    w4, b4 = lin(ks[6], ks[7], H3, 1)
    # Non-trivial LayerNorm affines so the fold below is actually exercised.
    g1 = 1.0 + 0.1 * jax.random.normal(ks[8], (H1,), jnp.float32)
    g2 = 1.0 + 0.1 * jax.random.normal(ks[9], (H2,), jnp.float32)
    g3 = 1.0 + 0.1 * jax.random.normal(ks[10], (H3,), jnp.float32)
    be1 = jnp.full((H1,), 0.05, jnp.float32)
    be2 = jnp.full((H2,), -0.05, jnp.float32)
    be3 = jnp.full((H3,), 0.05, jnp.float32)
    return (w1, b1, g1, be1, w2, b2, g2, be2, w3, b3, g3, be3, w4, b4)


def fold_params(raw):
    """Fold each LN's (gamma, beta) into the following Linear and prep layouts.

        LN_out @ W + b  =  norm @ (gamma[:, None] * W) + (beta @ W + b)

    Folding is done in f32; only the two big folded matrices are then cast to
    bf16 (halves weight DMA / VMEM residency, MXU-native on v5e/v6e/v7x).
    """
    (w1, b1, g1, be1, w2, b2, g2, be2, w3, b3, g3, be3, w4, b4) = raw
    w1p = jnp.pad(w1, ((0, K_PAD - NUM_SENSORS), (0, 0)))        # (8, 512)
    w2f = g1[:, None] * w2
    b2f = be1[None, :] @ w2 + b2
    w3f = g2[:, None] * w3
    b3f = be2[None, :] @ w3 + b3
    w4f = (g3[:, None] * w4).T                                   # (1, 512) row
    b4f = be3[None, :] @ w4 + b4                                 # (1, 1)
    # TODO(synk): on v5e (MXU near-binding, int8 at 2x the bf16 rate) w2f/w3f
    # could be int8 per-channel-quantized; v7x's MXU has no int path, so bf16
    # is the cross-generation default here.
    return (w1p, b1,
            w2f.astype(jnp.bfloat16), b2f,
            w3f.astype(jnp.bfloat16), b3f,
            w4f, b4f)


def reference_forward(x, raw):
    """Pure-JAX f32 reference matching the PyTorch module in eval mode."""
    (w1, b1, g1, be1, w2, b2, g2, be2, w3, b3, g3, be3, w4, b4) = raw

    def ln(h, g, b):
        mu = jnp.mean(h, axis=-1, keepdims=True)
        var = jnp.mean((h - mu) ** 2, axis=-1, keepdims=True)
        return (h - mu) / jnp.sqrt(var + LN_EPS) * g + b

    h = ln(jnp.maximum(x @ w1 + b1, 0.0), g1, be1)
    h = ln(jnp.maximum(h @ w2 + b2, 0.0), g2, be2)
    h = ln(jnp.maximum(h @ w3 + b3, 0.0), g3, be3)
    return h @ w4 + b4


def wavelength_predictor(x, kernel_params, *, block_m=512):
    """x: [batch, 7] float32 -> [batch, 1] float32 (eval-mode forward).

    block_m is a sweepable batch-tile size (512-1024 recommended at large
    batch); all weights stay VMEM-resident across the 1-D batch grid, so the
    per-step DMA is only the (tm, 8) x tile and the (tm, 1) output tile.
    """
    B = x.shape[0]
    x = x.astype(jnp.float32)

    # Batch tile: multiple of 8 (f32 sublane tile); large to amortize the
    # ~0.35 us per-grid-step overhead and keep the MXU fed per step.
    tm = block_m if B >= block_m else max(8, ((B + 7) // 8) * 8)
    bp = ((B + tm - 1) // tm) * tm
    # Pad batch to a tile multiple and the sensor dim 7 -> 8 (MXU contraction).
    # Zero-padded batch rows produce finite garbage (var ~ 0 -> rsqrt(eps)
    # scale) that is sliced off below -- intentional, not a NaN source.
    x = jnp.pad(x, ((0, bp - B), (0, K_PAD - NUM_SENSORS)))

    def const_spec(p):
        # Full-array block, same block index every grid step -> DMA'd once and
        # VMEM-resident (weight-stationary).  Constants total ~2 MiB, so even
        # default double-buffering stays far under every generation's VMEM.
        return pl.BlockSpec(p.shape, lambda i: (0, 0))

    out = pl.pallas_call(
        wavelength_predictor_kernel,
        out_shape=jax.ShapeDtypeStruct((bp, 1), jnp.float32),
        grid_spec=pltpu.PrefetchScalarGridSpec(
            num_scalar_prefetch=0,
            grid=(bp // tm,),
            in_specs=[pl.BlockSpec((tm, K_PAD), lambda i: (i, 0))]
                     + [const_spec(p) for p in kernel_params],
            out_specs=pl.BlockSpec((tm, 1), lambda i: (i, 0)),
        ),
        compiler_params=pltpu.CompilerParams(
            dimension_semantics=("parallel",),   # megacore batch split on v7x
            vmem_limit_bytes=48 << 20,           # <= 48 MiB: safe on v7x's 64 MiB
        ),
    )(x, *kernel_params)

    return out[:B] if bp != B else out


# TODO(synk): Dropout is a no-op here (eval-mode forward); training-mode dropout
#             would use pltpu.prng_seed / pltpu.prng_random_bits inside the kernel.


if __name__ == "__main__":
    key = jax.random.PRNGKey(0)
    k_x, k_p = jax.random.split(key)

    batch = 8
    x = jax.random.normal(k_x, (batch, NUM_SENSORS), jnp.float32)
    raw = init_raw_params(k_p)
    kernel_params = fold_params(raw)

    y = wavelength_predictor(x, kernel_params)
    jax.block_until_ready(y)

    assert y.shape == (batch, 1) and y.dtype == jnp.float32
    assert bool(jnp.all(jnp.isfinite(y)))

    # Correctness vs the pure-f32 reference (bf16 weights -> loose tolerance).
    y_ref = reference_forward(x, raw)
    max_err = float(jnp.max(jnp.abs(y - y_ref)))
    assert max_err < 1e-1, f"max abs err vs reference: {max_err}"

    print("KERNEL_OK")
</pallas_src>

<mosaic_0001>
module attributes {stable_mosaic.version = 11 : i64} {
  func.func @wavelength_predictor_kernel(%arg0: i32, %arg1: memref<8x8xf32, #tpu.memory_space<vmem>>, %arg2: memref<8x512xf32, #tpu.memory_space<vmem>>, %arg3: memref<1x512xf32, #tpu.memory_space<vmem>>, %arg4: memref<512x1024xbf16, #tpu.memory_space<vmem>>, %arg5: memref<1x1024xf32, #tpu.memory_space<vmem>>, %arg6: memref<1024x512xbf16, #tpu.memory_space<vmem>>, %arg7: memref<1x512xf32, #tpu.memory_space<vmem>>, %arg8: memref<1x512xf32, #tpu.memory_space<vmem>>, %arg9: memref<1x1xf32, #tpu.memory_space<vmem>>, %arg10: memref<8x1xf32, #tpu.memory_space<vmem>>) attributes {dimension_semantics = [#tpu.dimension_semantics<parallel>], iteration_bounds = array<i64: 1>, scalar_prefetch = 0 : i64, scratch_operands = 0 : i64, tpu.core_type = #tpu.core_type<tc>, window_params = [{transform_indices = @transform_0, window_bounds = array<i64: 8, 8>}, {pipeline_mode = #tpu.pipeline_mode<synchronous>, transform_indices = @transform_1, window_bounds = array<i64: 8, 512>}, {pipeline_mode = #tpu.pipeline_mode<synchronous>, transform_indices = @transform_2, window_bounds = array<i64: 1, 512>}, {pipeline_mode = #tpu.pipeline_mode<synchronous>, transform_indices = @transform_3, window_bounds = array<i64: 512, 1024>}, {pipeline_mode = #tpu.pipeline_mode<synchronous>, transform_indices = @transform_4, window_bounds = array<i64: 1, 1024>}, {pipeline_mode = #tpu.pipeline_mode<synchronous>, transform_indices = @transform_5, window_bounds = array<i64: 1024, 512>}, {pipeline_mode = #tpu.pipeline_mode<synchronous>, transform_indices = @transform_6, window_bounds = array<i64: 1, 512>}, {pipeline_mode = #tpu.pipeline_mode<synchronous>, transform_indices = @transform_7, window_bounds = array<i64: 1, 512>}, {pipeline_mode = #tpu.pipeline_mode<synchronous>, transform_indices = @transform_8, window_bounds = array<i64: 1, 1>}, {transform_indices = @transform_9, window_bounds = array<i64: 8, 1>}]} {
    %c0 = arith.constant 0 : index
    %c0_0 = arith.constant 0 : index
    %0 = vector.load %arg1[%c0, %c0_0] : memref<8x8xf32, #tpu.memory_space<vmem>>, vector<8x8xf32>
    %c0_1 = arith.constant 0 : index
    %c0_2 = arith.constant 0 : index
    %1 = vector.load %arg2[%c0_1, %c0_2] : memref<8x512xf32, #tpu.memory_space<vmem>>, vector<8x512xf32>
    %cst = arith.constant dense<0.000000e+00> : vector<8x512xf32>
    %2 = tpu.matmul %0, %1, %cst {dimension_numbers = #tpu.dot_dimension_numbers<[1], [0], [0], [1], [0, 0, 1, 1], [], []>} : vector<8x8xf32>, vector<8x512xf32>, vector<8x512xf32> -> vector<8x512xf32>
    %c0_3 = arith.constant 0 : index
    %c0_4 = arith.constant 0 : index
    %3 = vector.load %arg3[%c0_3, %c0_4] : memref<1x512xf32, #tpu.memory_space<vmem>>, vector<1x512xf32>
    %4 = vector.broadcast %3 : vector<1x512xf32> to vector<8x512xf32>
    %5 = arith.addf %2, %4 : vector<8x512xf32>
    %cst_5 = arith.constant 0.000000e+00 : f32
    %6 = vector.broadcast %cst_5 : f32 to vector<8x512xf32>
    %7 = arith.maximumf %5, %6 : vector<8x512xf32>
    %cst_6 = arith.constant dense<0.000000e+00> : vector<8xf32>
    %8 = vector.multi_reduction <add>, %7, %cst_6 [1] : vector<8x512xf32> to vector<8xf32>
    %9 = vector.shape_cast %8 : vector<8xf32> to vector<8x1xf32>
    %cst_7 = arith.constant 0.001953125 : f32
    %10 = vector.broadcast %cst_7 : f32 to vector<8x1xf32>
    %11 = arith.mulf %9, %10 : vector<8x1xf32>
    %12 = arith.mulf %7, %7 : vector<8x512xf32>
    %cst_8 = arith.constant dense<0.000000e+00> : vector<8xf32>
    %13 = vector.multi_reduction <add>, %12, %cst_8 [1] : vector<8x512xf32> to vector<8xf32>
    %14 = vector.shape_cast %13 : vector<8xf32> to vector<8x1xf32>
    %cst_9 = arith.constant 0.001953125 : f32
    %15 = vector.broadcast %cst_9 : f32 to vector<8x1xf32>
    %16 = arith.mulf %14, %15 : vector<8x1xf32>
    %17 = arith.mulf %11, %11 : vector<8x1xf32>
    %18 = arith.subf %16, %17 : vector<8x1xf32>
    %cst_10 = arith.constant 0.000000e+00 : f32
    %19 = vector.broadcast %cst_10 : f32 to vector<8x1xf32>
    %20 = arith.maximumf %18, %19 : vector<8x1xf32>
    %21 = vector.broadcast %11 : vector<8x1xf32> to vector<8x512xf32>
    %22 = arith.subf %7, %21 : vector<8x512xf32>
    %cst_11 = arith.constant 9.99999974E-6 : f32
    %23 = vector.broadcast %cst_11 : f32 to vector<8x1xf32>
    %24 = arith.addf %20, %23 : vector<8x1xf32>
    %25 = math.rsqrt %24 : vector<8x1xf32>
    %26 = vector.broadcast %25 : vector<8x1xf32> to vector<8x512xf32>
    %27 = arith.mulf %22, %26 : vector<8x512xf32>
    %28 = arith.truncf %27 : vector<8x512xf32> to vector<8x512xbf16>
    %c0_12 = arith.constant 0 : index
    %c0_13 = arith.constant 0 : index
    %29 = vector.load %arg4[%c0_12, %c0_13] : memref<512x1024xbf16, #tpu.memory_space<vmem>>, vector<512x1024xbf16>
    %cst_14 = arith.constant dense<0.000000e+00> : vector<8x1024xf32>
    %30 = tpu.matmul %28, %29, %cst_14 {dimension_numbers = #tpu.dot_dimension_numbers<[1], [0], [0], [1], [0, 0, 1, 1], [], []>} : vector<8x512xbf16>, vector<512x1024xbf16>, vector<8x1024xf32> -> vector<8x1024xf32>
    %c0_15 = arith.constant 0 : index
    %c0_16 = arith.constant 0 : index
    %31 = vector.load %arg5[%c0_15, %c0_16] : memref<1x1024xf32, #tpu.memory_space<vmem>>, vector<1x1024xf32>
    %32 = vector.broadcast %31 : vector<1x1024xf32> to vector<8x1024xf32>
    %33 = arith.addf %30, %32 : vector<8x1024xf32>
    %cst_17 = arith.constant 0.000000e+00 : f32
    %34 = vector.broadcast %cst_17 : f32 to vector<8x1024xf32>
    %35 = arith.maximumf %33, %34 : vector<8x1024xf32>
    %cst_18 = arith.constant dense<0.000000e+00> : vector<8xf32>
    %36 = vector.multi_reduction <add>, %35, %cst_18 [1] : vector<8x1024xf32> to vector<8xf32>
    %37 = vector.shape_cast %36 : vector<8xf32> to vector<8x1xf32>
    %cst_19 = arith.constant 9.765625E-4 : f32
    %38 = vector.broadcast %cst_19 : f32 to vector<8x1xf32>
    %39 = arith.mulf %37, %38 : vector<8x1xf32>
    %40 = arith.mulf %35, %35 : vector<8x1024xf32>
    %cst_20 = arith.constant dense<0.000000e+00> : vector<8xf32>
    %41 = vector.multi_reduction <add>, %40, %cst_20 [1] : vector<8x1024xf32> to vector<8xf32>
    %42 = vector.shape_cast %41 : vector<8xf32> to vector<8x1xf32>
    %cst_21 = arith.constant 9.765625E-4 : f32
    %43 = vector.broadcast %cst_21 : f32 to vector<8x1xf32>
    %44 = arith.mulf %42, %43 : vector<8x1xf32>
    %45 = arith.mulf %39, %39 : vector<8x1xf32>
    %46 = arith.subf %44, %45 : vector<8x1xf32>
    %cst_22 = arith.constant 0.000000e+00 : f32
    %47 = vector.broadcast %cst_22 : f32 to vector<8x1xf32>
    %48 = arith.maximumf %46, %47 : vector<8x1xf32>
    %49 = vector.broadcast %39 : vector<8x1xf32> to vector<8x1024xf32>
    %50 = arith.subf %35, %49 : vector<8x1024xf32>
    %cst_23 = arith.constant 9.99999974E-6 : f32
    %51 = vector.broadcast %cst_23 : f32 to vector<8x1xf32>
    %52 = arith.addf %48, %51 : vector<8x1xf32>
    %53 = math.rsqrt %52 : vector<8x1xf32>
    %54 = vector.broadcast %53 : vector<8x1xf32> to vector<8x1024xf32>
    %55 = arith.mulf %50, %54 : vector<8x1024xf32>
    %56 = arith.truncf %55 : vector<8x1024xf32> to vector<8x1024xbf16>
    %c0_24 = arith.constant 0 : index
    %c0_25 = arith.constant 0 : index
    %57 = vector.load %arg6[%c0_24, %c0_25] : memref<1024x512xbf16, #tpu.memory_space<vmem>>, vector<1024x512xbf16>
    %cst_26 = arith.constant dense<0.000000e+00> : vector<8x512xf32>
    %58 = tpu.matmul %56, %57, %cst_26 {dimension_numbers = #tpu.dot_dimension_numbers<[1], [0], [0], [1], [0, 0, 1, 1], [], []>} : vector<8x1024xbf16>, vector<1024x512xbf16>, vector<8x512xf32> -> vector<8x512xf32>
    %c0_27 = arith.constant 0 : index
    %c0_28 = arith.constant 0 : index
    %59 = vector.load %arg7[%c0_27, %c0_28] : memref<1x512xf32, #tpu.memory_space<vmem>>, vector<1x512xf32>
    %60 = vector.broadcast %59 : vector<1x512xf32> to vector<8x512xf32>
    %61 = arith.addf %58, %60 : vector<8x512xf32>
    %cst_29 = arith.constant 0.000000e+00 : f32
    %62 = vector.broadcast %cst_29 : f32 to vector<8x512xf32>
    %63 = arith.maximumf %61, %62 : vector<8x512xf32>
    %cst_30 = arith.constant dense<0.000000e+00> : vector<8xf32>
    %64 = vector.multi_reduction <add>, %63, %cst_30 [1] : vector<8x512xf32> to vector<8xf32>
    %65 = vector.shape_cast %64 : vector<8xf32> to vector<8x1xf32>
    %cst_31 = arith.constant 0.001953125 : f32
    %66 = vector.broadcast %cst_31 : f32 to vector<8x1xf32>
    %67 = arith.mulf %65, %66 : vector<8x1xf32>
    %68 = arith.mulf %63, %63 : vector<8x512xf32>
    %cst_32 = arith.constant dense<0.000000e+00> : vector<8xf32>
    %69 = vector.multi_reduction <add>, %68, %cst_32 [1] : vector<8x512xf32> to vector<8xf32>
    %70 = vector.shape_cast %69 : vector<8xf32> to vector<8x1xf32>
    %cst_33 = arith.constant 0.001953125 : f32
    %71 = vector.broadcast %cst_33 : f32 to vector<8x1xf32>
    %72 = arith.mulf %70, %71 : vector<8x1xf32>
    %73 = arith.mulf %67, %67 : vector<8x1xf32>
    %74 = arith.subf %72, %73 : vector<8x1xf32>
    %cst_34 = arith.constant 0.000000e+00 : f32
    %75 = vector.broadcast %cst_34 : f32 to vector<8x1xf32>
    %76 = arith.maximumf %74, %75 : vector<8x1xf32>
    %77 = vector.broadcast %67 : vector<8x1xf32> to vector<8x512xf32>
    %78 = arith.subf %63, %77 : vector<8x512xf32>
    %cst_35 = arith.constant 9.99999974E-6 : f32
    %79 = vector.broadcast %cst_35 : f32 to vector<8x1xf32>
    %80 = arith.addf %76, %79 : vector<8x1xf32>
    %81 = math.rsqrt %80 : vector<8x1xf32>
    %82 = vector.broadcast %81 : vector<8x1xf32> to vector<8x512xf32>
    %83 = arith.mulf %78, %82 : vector<8x512xf32>
    %c0_36 = arith.constant 0 : index
    %c0_37 = arith.constant 0 : index
    %84 = vector.load %arg8[%c0_36, %c0_37] : memref<1x512xf32, #tpu.memory_space<vmem>>, vector<1x512xf32>
    %85 = vector.broadcast %84 : vector<1x512xf32> to vector<8x512xf32>
    %86 = arith.mulf %83, %85 : vector<8x512xf32>
    %cst_38 = arith.constant dense<0.000000e+00> : vector<8xf32>
    %87 = vector.multi_reduction <add>, %86, %cst_38 [1] : vector<8x512xf32> to vector<8xf32>
    %88 = vector.shape_cast %87 : vector<8xf32> to vector<8x1xf32>
    %c0_39 = arith.constant 0 : index
    %c0_40 = arith.constant 0 : index
    %89 = vector.load %arg9[%c0_39, %c0_40] : memref<1x1xf32, #tpu.memory_space<vmem>>, vector<1x1xf32>
    %90 = vector.broadcast %89 : vector<1x1xf32> to vector<8x1xf32>
    %91 = arith.addf %88, %90 : vector<8x1xf32>
    %c0_41 = arith.constant 0 : index
    %c0_42 = arith.constant 0 : index
    %92 = vector.load %arg10[%c0_41, %c0_42] : memref<8x1xf32, #tpu.memory_space<vmem>>, vector<8x1xf32>
    tpu.vector_store %arg10[%c0_41, %c0_42], %91 {strides = array<i32>} : memref<8x1xf32, #tpu.memory_space<vmem>>, vector<8x1xf32>,
    return
  }
  func.func @transform_0(%arg0: i32) -> (i32, i32) {
    %c0_i32 = arith.constant 0 : i32
    %c0_i32_0 = arith.constant 0 : i32
    return %arg0, %c0_i32 : i32, i32
  }
  func.func @transform_1(%arg0: i32) -> (i32, i32) {
    %c0_i32 = arith.constant 0 : i32
    %c0_i32_0 = arith.constant 0 : i32
    %c0_i32_1 = arith.constant 0 : i32
    return %c0_i32, %c0_i32_0 : i32, i32
  }
  func.func @transform_2(%arg0: i32) -> (i32, i32) {
    %c0_i32 = arith.constant 0 : i32
    %c0_i32_0 = arith.constant 0 : i32
    %c0_i32_1 = arith.constant 0 : i32
    return %c0_i32, %c0_i32_0 : i32, i32
  }
  func.func @transform_3(%arg0: i32) -> (i32, i32) {
    %c0_i32 = arith.constant 0 : i32
    %c0_i32_0 = arith.constant 0 : i32
    %c0_i32_1 = arith.constant 0 : i32
    return %c0_i32, %c0_i32_0 : i32, i32
  }
  func.func @transform_4(%arg0: i32) -> (i32, i32) {
    %c0_i32 = arith.constant 0 : i32
    %c0_i32_0 = arith.constant 0 : i32
    %c0_i32_1 = arith.constant 0 : i32
    return %c0_i32, %c0_i32_0 : i32, i32
  }
  func.func @transform_5(%arg0: i32) -> (i32, i32) {
    %c0_i32 = arith.constant 0 : i32
    %c0_i32_0 = arith.constant 0 : i32
    %c0_i32_1 = arith.constant 0 : i32
    return %c0_i32, %c0_i32_0 : i32, i32
  }
  func.func @transform_6(%arg0: i32) -> (i32, i32) {
    %c0_i32 = arith.constant 0 : i32
    %c0_i32_0 = arith.constant 0 : i32
    %c0_i32_1 = arith.constant 0 : i32
    return %c0_i32, %c0_i32_0 : i32, i32
  }
  func.func @transform_7(%arg0: i32) -> (i32, i32) {
    %c0_i32 = arith.constant 0 : i32
    %c0_i32_0 = arith.constant 0 : i32
    %c0_i32_1 = arith.constant 0 : i32
    return %c0_i32, %c0_i32_0 : i32, i32
  }
  func.func @transform_8(%arg0: i32) -> (i32, i32) {
    %c0_i32 = arith.constant 0 : i32
    %c0_i32_0 = arith.constant 0 : i32
    %c0_i32_1 = arith.constant 0 : i32
    return %c0_i32, %c0_i32_0 : i32, i32
  }
  func.func @transform_9(%arg0: i32) -> (i32, i32) {
    %c0_i32 = arith.constant 0 : i32
    %c0_i32_0 = arith.constant 0 : i32
    return %arg0, %c0_i32 : i32, i32
  }
}

</mosaic_0001>

<bundles_post_ra>
// kernel: tpu_custom_call.1
= control target key start
LH: loop header
LB: loop body
LE: loop exit
PB: predicated region body
PF: predicated region fallthrough
CT: control target
= control target key end

     0   :  { %s5584_s0 = inlined_call_operand.hbm [shape: f32[8,8], index: 0, kind: input, shape index: {}]   ;;  %s5585_s1 = inlined_call_operand.hbm [shape: f32[8,512], index: 1, kind: input, shape index: {}]   ;;  %s5586_s2 = inlined_call_operand.vmem [shape: f32[1,512], index: 2, kind: input, shape index: {}]   ;;  %s5587_s3 = inlined_call_operand.hbm [shape: bf16[512,1024], index: 3, kind: input, shape index: {}]   ;;  %s5588_s4 = inlined_call_operand.vmem [shape: f32[1,1024], index: 4, kind: input, shape index: {}]   ;;  %s5589_s5 = inlined_call_operand.hbm [shape: bf16[1024,512], index: 5, kind: input, shape index: {}]   ;;  %s5590_s6 = inlined_call_operand.vmem [shape: f32[1,512], index: 6, kind: input, shape index: {}]   ;;  %s5591_s7 = inlined_call_operand.vmem [shape: f32[1,512], index: 7, kind: input, shape index: {}]   ;;  %s5592_s8 = inlined_call_operand.<no memory space> [shape: f32[1,1], index: 8, kind: input, shape index: {}]   ;;  %s5593_s9 = inlined_call_operand.vmem [shape: f32[8,1], index: 9, kind: output, shape index: {}]  }
   0x1   :  { %v14_v0 = vstv %s5592_s8 }
   0x2   :  { %15 = vst [vmem:[#allocation2] sm:$0x1] %v14_v0 }
   0x3   :  { %16 = vsyncpa [#allocation4], 0 }
   0x4   :  { %17 = vsyncpa [#allocation6], 0 }
   0x5   :  { %18 = vsyncpa [#allocation9], 0  ;;  %s5293_s11 = smov [#allocation5]   ;;  %s5294_s13 = smov [#allocation3]  }
   0x6   :  { %s35_s12 = sshll.u32 %s5293_s11, 4  ;;  %s25_s14 = sshll.u32 %s5294_s13, 4  ;;  %s36_s12 = int_to_ptr.vmem [resolvable:$true] %s35_s12  ;;  %s26_s14 = int_to_ptr.vmem [resolvable:$true] %s25_s14 }
   0x7   :  { %s5199_s17 = scalar_lea.hbm %s5585_s1, 512 }
   0x8   :  { %p5200_p0 = scmp.ne.s32.totalorder %s5585_s1, %s5199_s17  ;;  %p5203_p1 = scmp.lt.u32.totalorder %s5199_s17, %s5585_s1 }
   0xa   :  { %p5205_p2 = pnand %p5203_p1, %p5200_p0 }
   0xc   :  { %5208 = shalt.err (!%p5205_p2)
}
   0xd   :  { %s5209_s21 = scalar_lea.vmem %s36_s12, 512  ;;  %p5214_p4 = scmp.lt.s32.totalorder %s36_s12, %s36_s12 }
   0xe   :  { %p5210_p3 = scmp.ne.s32.totalorder %s36_s12, %s5209_s21  ;;  %p5215_p5 = scmp.lt.s32.totalorder %s5209_s21, %s5209_s21 }
  0x10   :  { %p5216_p6 = por %p5215_p5, %p5214_p4 }
  0x12   :  { %p5217_p7 = pnand %p5216_p6, %p5210_p3 }
  0x14   :  { %5220 = shalt.err (!%p5217_p7)
}
  0x15   :  { %38 = dma.hbm_to_vmem [thread:$0]  %s5585_s1, 512, %s36_s12, [#allocation6]  }
  0x16   :  { %s5221_s26 = scalar_lea.hbm %s5584_s0, 128 }
  0x17   :  { %p5222_p8 = scmp.ne.s32.totalorder %s5584_s0, %s5221_s26  ;;  %p5225_p9 = scmp.lt.u32.totalorder %s5221_s26, %s5584_s0 }
  0x19   :  { %p5227_p10 = pnand %p5225_p9, %p5222_p8 }
  0x1b   :  { %5230 = shalt.err (!%p5227_p10)
}
  0x1c   :  { %s5231_s10 = scalar_lea.vmem %s26_s14, 128  ;;  %p5236_p12 = scmp.lt.s32.totalorder %s26_s14, %s26_s14 }
  0x1d   :  { %p5232_p11 = scmp.ne.s32.totalorder %s26_s14, %s5231_s10  ;;  %p5237_p13 = scmp.lt.s32.totalorder %s5231_s10, %s5231_s10 }
  0x1f   :  { %p5238_p0 = por %p5237_p13, %p5236_p12 }
  0x21   :  { %p5239_p1 = pnand %p5238_p0, %p5232_p11 }
  0x23   :  { %5242 = shalt.err (!%p5239_p1)
}
  0x24   :  { %28 = dma.hbm_to_vmem [thread:$0]  %s5584_s0, 128, %s26_s14, [#allocation4]  }
  0x25   :  { %s5295_s12 = smov [#allocation7]   ;;  %s5243_s17 = scalar_lea.hbm %s5587_s3, 32768 }
  0x26   :  { %s46_s13 = sshll.u32 %s5295_s12, 4  ;;  %p5244_p2 = scmp.ne.s32.totalorder %s5587_s3, %s5243_s17  ;;  %s47_s13 = int_to_ptr.vmem [resolvable:$true] %s46_s13 }
  0x27   :  { %p5247_p3 = scmp.lt.u32.totalorder %s5243_s17, %s5587_s3 }
  0x29   :  { %p5249_p4 = pnand %p5247_p3, %p5244_p2 }
  0x2b   :  { %5252 = shalt.err (!%p5249_p4)
}
  0x2c   :  { %s5253_s21 = scalar_lea.vmem %s47_s13, 32768  ;;  %p5258_p6 = scmp.lt.s32.totalorder %s47_s13, %s47_s13 }
  0x2d   :  { %p5254_p5 = scmp.ne.s32.totalorder %s47_s13, %s5253_s21  ;;  %p5259_p7 = scmp.lt.s32.totalorder %s5253_s21, %s5253_s21 }
  0x2f   :  { %p5260_p8 = por %p5259_p7, %p5258_p6 }
  0x31   :  { %p5261_p9 = pnand %p5260_p8, %p5254_p5 }
  0x33   :  { %5264 = shalt.err (!%p5261_p9)
}
  0x34   :  { %s5296_s0 = smov 512   ;;  %s5297_s14 = smov 32  }
  0x35   :  { %52 = dma.hbm_to_vmem [thread:$0]  %s5587_s3, 32768, %s47_s13, [#allocation6], %s5296_s0, %s5296_s0, %s5297_s14  }
  0x36   :  { %s5298_s24 = smov [#allocation8]   ;;  %s5265_s28 = scalar_lea.hbm %s5589_s5, 32768 }
  0x37   :  { %s60_s25 = sshll.u32 %s5298_s24, 4  ;;  %p5266_p10 = scmp.ne.s32.totalorder %s5589_s5, %s5265_s28  ;;  %s61_s25 = int_to_ptr.vmem [resolvable:$true] %s60_s25 }
  0x38   :  { %p5269_p11 = scmp.lt.u32.totalorder %s5265_s28, %s5589_s5 }
  0x3a   :  { %p5271_p12 = pnand %p5269_p11, %p5266_p10 }
  0x3c   :  { %5274 = shalt.err (!%p5271_p12)
}
  0x3d   :  { %s5275_s11 = scalar_lea.vmem %s61_s25, 32768  ;;  %p5280_p0 = scmp.lt.s32.totalorder %s61_s25, %s61_s25 }
  0x3e   :  { %p5276_p13 = scmp.ne.s32.totalorder %s61_s25, %s5275_s11  ;;  %p5281_p1 = scmp.lt.s32.totalorder %s5275_s11, %s5275_s11 }
  0x40   :  { %p5282_p2 = por %p5281_p1, %p5280_p0 }
  0x42   :  { %p5283_p3 = pnand %p5282_p2, %p5276_p13 }
  0x44   :  { %5286 = shalt.err (!%p5283_p3)
}
  0x45   :  { %s5299_s3 = smov 256   ;;  %s5300_s12 = smov 16  }
  0x46   :  { %66 = dma.hbm_to_vmem [thread:$0]  %s5589_s5, 32768, %s61_s25, [#allocation9], %s5299_s3, %s5299_s3, %s5300_s12  }
  0x47   :  { %5287 = dma.done.wait [#allocation4], 128  }
  0x48   :  { %5288 = vsyncadd [#allocation4], 4294967168 }
  0x49   :  { %5289 = dma.done.wait [#allocation6], 33280  }
  0x4a   :  { %5290 = vsyncadd [#allocation6], 4294934016 }
  0x4b   :  { %5291 = dma.done.wait [#allocation9], 32768  }
  0x4c   :  { %5292 = vsyncadd [#allocation9], 4294934528  ;;  %v5301_v1 = vmov 0.0   ;;  %v87_v2 = vld [vmem:[#allocation5 + $0x8] sm:$0xff]  ;;  %v86_v3 = vld [vmem:[#allocation5] sm:$0xff]  ;;  %vm112_vm0 = vcmask 64512  }
  0x4d   :  { %180 = vmatprep.mubr.f32.mxu0 %v5301_v1  ;;  %251 = vmatprep.mubr.f32.mxu1 %v5301_v1  ;;  %v85_v4 = vld [vmem:[#allocation3] sm:$0xff]  ;;  %v88_v6 = vld [vmem:[#allocation5 + $0x10] sm:$0xff]  ;;  %v295_v7 = vld [vmem:[#allocation7] sm:$0xff]  ;;  %vm4224_vm1 = vcmask 7168  }
  0x4e   :  { %116 = vmatprep.subr.mxu0 %v87_v2  ;;  %v89_v5 = vld [vmem:[#allocation5 + $0x18] sm:$0xff]  ;;  %v299_v8 = vld [vmem:[#allocation7 + $0x20] sm:$0xff]  ;;  %v296_v9 = vld [vmem:[#allocation7 + $0x8] sm:$0xff] }
  0x4f   :  { %117 = vmatpush1.msra.mxu0 %v86_v3  ;;  %187 = vmatprep.subr.mxu1 %v89_v5  ;;  %v4235_v10 = vcombine.low %v295_v7, %v299_v8  ;;  %v4236_v11 = vcombine.high %v295_v7, %v299_v8  ;;  %v300_v12 = vld [vmem:[#allocation7 + $0x28] sm:$0xff]  ;;  %v303_v13 = vld [vmem:[#allocation7 + $0x40] sm:$0xff] }
  0x50   :  { %4233 = vmatmul.mubr.msk.f32.vlgmr.msra.gmra.mrb[0].mxu0 %vm112_vm0, %v85_v4  ;;  %188 = vmatpush1.msra.mxu1 %v88_v6  ;;  %v307_v14 = vld [vmem:[#allocation7 + $0x60] sm:$0xff]  ;;  %v4237_v15 = vcombine.low %v296_v9, %v300_v12  ;;  %v4238_v16 = vcombine.high %v296_v9, %v300_v12  ;;  %v304_v18 = vld [vmem:[#allocation7 + $0x48] sm:$0xff] }
  0x51   :  { %4234 = vmatmul.mubr.msk.f32.vlgmr.msra.gmra.mrb[0].mxu1 %vm112_vm0, %v85_v4  ;;  %v4244_v17 = vcombine.high %v303_v13, %v307_v14  ;;  %v308_v19 = vld [vmem:[#allocation7 + $0x68] sm:$0xff]  ;;  %v311_v20 = vld [vmem:[#allocation7 + $0x80] sm:$0xff]  ;;  %1873 = vmatprep.subr.bf16.mxu0 %v4236_v11  ;;  %v4243_v25 = vcombine.low %v303_v13, %v307_v14 }
  0x52   :  { %v4246_v21 = vcombine.high %v304_v18, %v308_v19  ;;  %v315_v22 = vld [vmem:[#allocation7 + $0xa0] sm:$0xff]  ;;  %v312_v23 = vld [vmem:[#allocation7 + $0x88] sm:$0xff]  ;;  %1955 = vmatprep.subr.bf16.mxu1 %v4238_v16  ;;  %1874 = vmatpush1.bf16.msra.mxu0 %v4235_v10  ;;  %v4245_v26 = vcombine.low %v304_v18, %v308_v19 }
  0x53   :  { %v316_v24 = vld [vmem:[#allocation7 + $0xa8] sm:$0xff]  ;;  %1956 = vmatpush1.bf16.msra.mxu1 %v4237_v15  ;;  %1875 = vmatprep.subr.bf16.mxu0 %v4244_v17  ;;  %v4252_v27 = vcombine.high %v311_v20, %v315_v22  ;;  %v319_v29 = vld [vmem:[#allocation7 + $0xc0] sm:$0xff]  ;;  %v4251_v33 = vcombine.low %v311_v20, %v315_v22 }
  0x54   :  { %1957 = vmatprep.subr.bf16.mxu1 %v4246_v21  ;;  %v4254_v28 = vcombine.high %v312_v23, %v316_v24  ;;  %v323_v30 = vld [vmem:[#allocation7 + $0xe0] sm:$0xff]  ;;  %v320_v31 = vld [vmem:[#allocation7 + $0xc8] sm:$0xff]  ;;  %v4253_v34 = vcombine.low %v312_v23, %v316_v24  ;;  %v92_v23 = vlaneseq }
  0x55   :  { %v324_v32 = vld [vmem:[#allocation7 + $0xe8] sm:$0xff]  ;;  %v4260_v35 = vcombine.high %v319_v29, %v323_v30  ;;  %v327_v37 = vld [vmem:[#allocation7 + $0x100] sm:$0xff]  ;;  %v4259_v41 = vcombine.low %v319_v29, %v323_v30 }
  0x56   :  { %1876 = vmatpush1.bf16.msra.mxu0 %v4243_v25  ;;  %v4262_v36 = vcombine.high %v320_v31, %v324_v32  ;;  %v331_v38 = vld [vmem:[#allocation7 + $0x120] sm:$0xff]  ;;  %v328_v39 = vld [vmem:[#allocation7 + $0x108] sm:$0xff]  ;;  %v4261_v42 = vcombine.low %v320_v31, %v324_v32  ;;  %v5403_v24 = vshrl.u32 %v92_v23, 7 }
  0x57   :  { %1958 = vmatpush1.bf16.msra.mxu1 %v4245_v26  ;;  %1877 = vmatprep.subr.bf16.mxu0 %v4252_v27  ;;  %v332_v40 = vld [vmem:[#allocation7 + $0x128] sm:$0xff]  ;;  %v4268_v43 = vcombine.high %v327_v37, %v331_v38  ;;  %v335_v45 = vld [vmem:[#allocation7 + $0x140] sm:$0xff]  ;;  %v4267_v49 = vcombine.low %v327_v37, %v331_v38  ;;  %v90_v26 = vld [vmem:[%s5586_s2] sm:$0xf] }
  0x58   :  { %1959 = vmatprep.subr.bf16.mxu1 %v4254_v28  ;;  %v4270_v44 = vcombine.high %v328_v39, %v332_v40  ;;  %v339_v46 = vld [vmem:[#allocation7 + $0x160] sm:$0xff]  ;;  %v336_v47 = vld [vmem:[#allocation7 + $0x148] sm:$0xff]  ;;  %v4269_v50 = vcombine.low %v328_v39, %v332_v40  ;;  %v5406_v25 = vsub.s32 0, %v5403_v24  ;;  %v5412_v27 = vsub.s32 1, %v5403_v24 }
  0x59   :  { %v340_v48 = vld [vmem:[#allocation7 + $0x168] sm:$0xff]  ;;  %v4276_v51 = vcombine.high %v335_v45, %v339_v46  ;;  %v343_v53 = vld [vmem:[#allocation7 + $0x180] sm:$0xff]  ;;  %v4275_v57 = vcombine.low %v335_v45, %v339_v46  ;;  %v5415_v28 = vsub.s32 2, %v5403_v24  ;;  %v5418_v29 = vsub.s32 3, %v5403_v24 }
  0x5a   :  { %1878 = vmatpush1.bf16.msra.mxu0 %v4251_v33  ;;  %v4278_v52 = vcombine.high %v336_v47, %v340_v48  ;;  %v347_v54 = vld [vmem:[#allocation7 + $0x1a0] sm:$0xff]  ;;  %v344_v55 = vld [vmem:[#allocation7 + $0x188] sm:$0xff]  ;;  %v4277_v58 = vcombine.low %v336_v47, %v340_v48  ;;  %v95_v30 = vrot.slane %v90_v26, %v5406_v25  ;;  %v99_v31 = vrot.slane %v90_v26, %v5412_v27 }
  0x5b   :  { %1960 = vmatpush1.bf16.msra.mxu1 %v4253_v34  ;;  %1879 = vmatprep.subr.bf16.mxu0 %v4260_v35  ;;  %v348_v56 = vld [vmem:[#allocation7 + $0x1a8] sm:$0xff]  ;;  %v4284_v59 = vcombine.high %v343_v53, %v347_v54  ;;  %v351_v61 = vld [vmem:[#allocation7 + $0x1c0] sm:$0xff]  ;;  %v4283_v1 = vcombine.low %v343_v53, %v347_v54  ;;  %v103_v32 = vrot.slane %v90_v26, %v5415_v28 }
  0x5c   :  { %1961 = vmatprep.subr.bf16.mxu1 %v4262_v36  ;;  %v4286_v60 = vcombine.high %v344_v55, %v348_v56  ;;  %v355_v62 = vld [vmem:[#allocation7 + $0x1e0] sm:$0xff]  ;;  %v352_v63 = vld [vmem:[#allocation7 + $0x1c8] sm:$0xff]  ;;  %v4285_v2 = vcombine.low %v344_v55, %v348_v56  ;;  %v107_v34 = vrot.slane %v90_v26, %v5418_v29 }
  0x5d   :  { %v356_v0 = vld [vmem:[#allocation7 + $0x1e8] sm:$0xff]  ;;  %v4292_v3 = vcombine.high %v351_v61, %v355_v62  ;;  %v359_v5 = vld [vmem:[#allocation7 + $0x200] sm:$0xff]  ;;  %v4291_v9 = vcombine.low %v351_v61, %v355_v62 }
  0x5e   :  { %1880 = vmatpush1.bf16.msra.mxu0 %v4259_v41  ;;  %v4294_v4 = vcombine.high %v352_v63, %v356_v0  ;;  %v363_v6 = vld [vmem:[#allocation7 + $0x220] sm:$0xff]  ;;  %v360_v7 = vld [vmem:[#allocation7 + $0x208] sm:$0xff]  ;;  %v4293_v10 = vcombine.low %v352_v63, %v356_v0 }
  0x5f   :  { %1962 = vmatpush1.bf16.msra.mxu1 %v4261_v42  ;;  %1881 = vmatprep.subr.bf16.mxu0 %v4268_v43  ;;  %v364_v8 = vld [vmem:[#allocation7 + $0x228] sm:$0xff]  ;;  %v4300_v11 = vcombine.high %v359_v5, %v363_v6  ;;  %v367_v13 = vld [vmem:[#allocation7 + $0x240] sm:$0xff]  ;;  %v4299_v17 = vcombine.low %v359_v5, %v363_v6 }
  0x60   :  { %1963 = vmatprep.subr.bf16.mxu1 %v4270_v44  ;;  %v4302_v12 = vcombine.high %v360_v7, %v364_v8  ;;  %v371_v14 = vld [vmem:[#allocation7 + $0x260] sm:$0xff]  ;;  %v368_v15 = vld [vmem:[#allocation7 + $0x248] sm:$0xff]  ;;  %v4301_v18 = vcombine.low %v360_v7, %v364_v8 }
  0x61   :  { %v372_v16 = vld [vmem:[#allocation7 + $0x268] sm:$0xff]  ;;  %v4308_v19 = vcombine.high %v367_v13, %v371_v14  ;;  %v4307_v21 = vcombine.low %v367_v13, %v371_v14  ;;  %v375_v56 = vld [vmem:[#allocation7 + $0x280] sm:$0xff] }
  0x62   :  { %1882 = vmatpush1.bf16.msra.mxu0 %v4267_v49  ;;  %v4310_v20 = vcombine.high %v368_v15, %v372_v16  ;;  %v4309_v22 = vcombine.low %v368_v15, %v372_v16  ;;  %v380_v61 = vld [vmem:[#allocation7 + $0x2a8] sm:$0xff]  ;;  %v383_v0 = vld [vmem:[#allocation7 + $0x2c0] sm:$0xff] }
  0x63   :  { %1964 = vmatpush1.bf16.msra.mxu1 %v4269_v50  ;;  %1883 = vmatprep.subr.bf16.mxu0 %v4276_v51  ;;  %v391_v8 = vld [vmem:[#allocation7 + $0x300] sm:$0xff] }
  0x64   :  { %1965 = vmatprep.subr.bf16.mxu1 %v4278_v52  ;;  %v399_v16 = vld [vmem:[#allocation7 + $0x340] sm:$0xff] }
  0x65   :  { %v411_v23 = vld [vmem:[#allocation7 + $0x3a0] sm:$0xff] }
  0x66   :  { %1884 = vmatpush1.bf16.msra.mxu0 %v4275_v57  ;;  %v379_v57 = vld [vmem:[#allocation7 + $0x2a0] sm:$0xff] }
  0x67   :  { %1966 = vmatpush1.bf16.msra.mxu1 %v4277_v58  ;;  %1885 = vmatprep.subr.bf16.mxu0 %v4284_v59  ;;  %v376_v58 = vld [vmem:[#allocation7 + $0x288] sm:$0xff]  ;;  %v4315_v59 = vcombine.low %v375_v56, %v379_v57 }
  0x68   :  { %1967 = vmatprep.subr.bf16.mxu1 %v4286_v60  ;;  %v4316_v60 = vcombine.high %v375_v56, %v379_v57  ;;  %v4317_v62 = vcombine.low %v376_v58, %v380_v61  ;;  %v4318_v63 = vcombine.high %v376_v58, %v380_v61 }
  0x6a   :  { %1886 = vmatpush1.bf16.msra.mxu0 %v4283_v1  ;;  %v387_v1 = vld [vmem:[#allocation7 + $0x2e0] sm:$0xff] }
  0x6b   :  { %1968 = vmatpush1.bf16.msra.mxu1 %v4285_v2  ;;  %1887 = vmatprep.subr.bf16.mxu0 %v4292_v3  ;;  %v384_v2 = vld [vmem:[#allocation7 + $0x2c8] sm:$0xff]  ;;  %v4324_v3 = vcombine.high %v383_v0, %v387_v1  ;;  %v4323_v5 = vcombine.low %v383_v0, %v387_v1 }
  0x6c   :  { %1969 = vmatprep.subr.bf16.mxu1 %v4294_v4  ;;  %v388_v4 = vld [vmem:[#allocation7 + $0x2e8] sm:$0xff] }
  0x6d   :  { %v4325_v6 = vcombine.low %v384_v2, %v388_v4  ;;  %v4326_v7 = vcombine.high %v384_v2, %v388_v4 }
  0x6e   :  { %1888 = vmatpush1.bf16.msra.mxu0 %v4291_v9  ;;  %v395_v9 = vld [vmem:[#allocation7 + $0x320] sm:$0xff] }
  0x6f   :  { %1970 = vmatpush1.bf16.msra.mxu1 %v4293_v10  ;;  %1889 = vmatprep.subr.bf16.mxu0 %v4300_v11  ;;  %v392_v10 = vld [vmem:[#allocation7 + $0x308] sm:$0xff]  ;;  %v4332_v11 = vcombine.high %v391_v8, %v395_v9  ;;  %v4331_v13 = vcombine.low %v391_v8, %v395_v9  ;;  %v431_v8 = vld [vmem:[#allocation7 + $0x440] sm:$0xff] }
  0x70   :  { %1971 = vmatprep.subr.bf16.mxu1 %v4302_v12  ;;  %v396_v12 = vld [vmem:[#allocation7 + $0x328] sm:$0xff] }
  0x71   :  { %v4333_v14 = vcombine.low %v392_v10, %v396_v12  ;;  %v4334_v15 = vcombine.high %v392_v10, %v396_v12  ;;  %v432_v12 = vld [vmem:[#allocation7 + $0x448] sm:$0xff] }
  0x72   :  { %1890 = vmatpush1.bf16.msra.mxu0 %v4299_v17  ;;  %v403_v17 = vld [vmem:[#allocation7 + $0x360] sm:$0xff] }
  0x73   :  { %1972 = vmatpush1.bf16.msra.mxu1 %v4301_v18  ;;  %1891 = vmatprep.subr.bf16.mxu0 %v4308_v19  ;;  %v400_v18 = vld [vmem:[#allocation7 + $0x348] sm:$0xff]  ;;  %v4339_v19 = vcombine.low %v399_v16, %v403_v17 }
  0x74   :  { %1973 = vmatprep.subr.bf16.mxu1 %v4310_v20  ;;  %v4340_v20 = vcombine.high %v399_v16, %v403_v17  ;;  %v440_v16 = vld [vmem:[#allocation7 + $0x488] sm:$0xff] }
  0x75   :  { %v444_v17 = vld [vmem:[#allocation7 + $0x4a8] sm:$0xff] }
  0x76   :  { %1892 = vmatpush1.bf16.msra.mxu0 %v4307_v21  ;;  %v404_v21 = vld [vmem:[#allocation7 + $0x368] sm:$0xff] }
  0x77   :  { %1974 = vmatpush1.bf16.msra.mxu1 %v4309_v22  ;;  %1893 = vmatprep.subr.bf16.mxu0 %v4316_v60  ;;  %v407_v22 = vld [vmem:[#allocation7 + $0x380] sm:$0xff]  ;;  %v4341_v26 = vcombine.low %v400_v18, %v404_v21 }
  0x78   :  { %1975 = vmatprep.subr.bf16.mxu1 %v4318_v63 }
  0x7a   :  { %1894 = vmatpush1.bf16.msra.mxu0 %v4315_v59 }
  0x7b   :  { %1976 = vmatpush1.bf16.msra.mxu1 %v4317_v62  ;;  %1895 = vmatprep.subr.bf16.mxu0 %v4324_v3 }
  0x7c   :  { %1977 = vmatprep.subr.bf16.mxu1 %v4326_v7 }
  0x7e   :  { %1896 = vmatpush1.bf16.msra.mxu0 %v4323_v5 }
  0x7f   :  { %1978 = vmatpush1.bf16.msra.mxu1 %v4325_v6  ;;  %1897 = vmatprep.subr.bf16.mxu0 %v4332_v11  ;;  %v435_v11 = vld [vmem:[#allocation7 + $0x460] sm:$0xff] }
  0x80   :  { %1979 = vmatprep.subr.bf16.mxu1 %v4334_v15 }
  0x82   :  { %1898 = vmatpush1.bf16.msra.mxu0 %v4331_v13  ;;  %v436_v13 = vld [vmem:[#allocation7 + $0x468] sm:$0xff] }
  0x83   :  { %1980 = vmatpush1.bf16.msra.mxu1 %v4333_v14  ;;  %1899 = vmatprep.subr.bf16.mxu0 %v4340_v20  ;;  %v4373_v20 = vcombine.low %v432_v12, %v436_v13 }
  0x86   :  { %1900 = vmatpush1.bf16.msra.mxu0 %v4339_v19  ;;  %v4371_v19 = vcombine.low %v431_v8, %v435_v11 }
 0x123   :  { %v182_v33 = vpop.f32.mrb[0].mxu0 }
 0x124   :  { %v183_v35 = vadd.f32 %v182_v33, %v95_v30  ;;  %v184_v36 = vpop.f32.mrb[1].mxu0  ;;  %v253_v37 = vpop.f32.mrb[0].mxu1  ;;  %v4342_v30 = vcombine.high %v400_v18, %v404_v21  ;;  %v412_v33 = vld [vmem:[#allocation7 + $0x3a8] sm:$0xff] }
 0x125   :  { %v185_v38 = vadd.f32 %v184_v36, %v99_v31  ;;  %v254_v39 = vadd.f32 %v253_v37, %v103_v32  ;;  %v255_v40 = vpop.f32.mrb[1].mxu1  ;;  %v4348_v31 = vcombine.high %v407_v22, %v411_v23  ;;  %v408_v32 = vld [vmem:[#allocation7 + $0x388] sm:$0xff]  ;;  %v419_v36 = vld [vmem:[#allocation7 + $0x3e0] sm:$0xff] }
 0x126   :  { %v5424_v41 = vmax.f32 %v183_v35, 0.0  ;;  %v256_v44 = vadd.f32 %v255_v40, %v107_v34  ;;  %v415_v34 = vld [vmem:[#allocation7 + $0x3c0] sm:$0xff]  ;;  %v4350_v35 = vcombine.high %v408_v32, %v412_v33  ;;  %v416_v37 = vld [vmem:[#allocation7 + $0x3c8] sm:$0xff]  ;;  %1981 = vmatprep.subr.bf16.mxu1 %v4342_v30  ;;  %v4349_v40 = vcombine.low %v408_v32, %v412_v33 }
 0x127   :  { %v5426_v42 = vmax.f32 %v185_v38, 0.0  ;;  %v5428_v43 = vmax.f32 %v254_v39, 0.0  ;;  %v420_v38 = vld [vmem:[#allocation7 + $0x3e8] sm:$0xff]  ;;  %v4347_v39 = vcombine.low %v407_v22, %v411_v23  ;;  %1982 = vmatpush1.bf16.msra.mxu1 %v4341_v26  ;;  %1901 = vmatprep.subr.bf16.mxu0 %v4348_v31  ;;  %v4382_v22 = vcombine.high %v440_v16, %v444_v17  ;;  %v447_v23 = vld [vmem:[#allocation7 + $0x4c0] sm:$0xff] }
 0x128   :  { %v268_v45 = vmul.f32 %v5424_v41, %v5424_v41  ;;  %v5438_v49 = vmax.f32 %v256_v44, 0.0  ;;  %v4356_v44 = vcombine.high %v415_v34, %v419_v36  ;;  %1983 = vmatprep.subr.bf16.mxu1 %v4350_v35  ;;  %v451_v26 = vld [vmem:[#allocation7 + $0x4e0] sm:$0xff]  ;;  %v448_v30 = vld [vmem:[#allocation7 + $0x4c8] sm:$0xff]  ;;  %v4381_v33 = vcombine.low %v440_v16, %v444_v17 }
 0x129   :  { %v269_v46 = vmul.f32 %v5426_v42, %v5426_v42  ;;  %v262_v47 = vadd.f32 %v5426_v42, %v5424_v41  ;;  %v270_v48 = vmul.f32 %v5428_v43, %v5428_v43  ;;  %1902 = vmatpush1.bf16.msra.mxu0 %v4347_v39  ;;  %v452_v31 = vld [vmem:[#allocation7 + $0x4e8] sm:$0xff]  ;;  %v499_v16 = vld [vmem:[#allocation7 + $0x660] sm:$0xff] }
 0x12a   :  { %v271_v54 = vmul.f32 %v5438_v49, %v5438_v49  ;;  %1903 = vmatprep.subr.bf16.mxu0 %v4356_v44  ;;  %v4390_v35 = vcombine.high %v448_v30, %v452_v31  ;;  %v460_v39 = vld [vmem:[#allocation7 + $0x528] sm:$0xff]  ;;  %v4389_v44 = vcombine.low %v448_v30, %v452_v31  ;;  %v507_v30 = vld [vmem:[#allocation7 + $0x6a0] sm:$0xff] }
 0x12b   :  { %v263_v50 = vadd.f32 %v262_v47, %v5428_v43  ;;  %v272_v51 = vadd.f32 %v269_v46, %v268_v45  ;;  %v4358_v45 = vcombine.high %v416_v37, %v420_v38  ;;  %v4355_v46 = vcombine.low %v415_v34, %v419_v36  ;;  %1984 = vmatpush1.bf16.msra.mxu1 %v4349_v40  ;;  %v455_v36 = vld [vmem:[#allocation7 + $0x500] sm:$0xff]  ;;  %v496_v17 = vld [vmem:[#allocation7 + $0x648] sm:$0xff] }
 0x12c   :  { %v4357_v47 = vcombine.low %v416_v37, %v420_v38  ;;  %v4388_v34 = vcombine.high %v447_v23, %v451_v26  ;;  %v459_v37 = vld [vmem:[#allocation7 + $0x520] sm:$0xff]  ;;  %v456_v38 = vld [vmem:[#allocation7 + $0x508] sm:$0xff]  ;;  %v4387_v40 = vcombine.low %v447_v23, %v451_v26 }
 0x12d   :  { %v264_v52 = vadd.f32 %v263_v50, %v5438_v49  ;;  %v273_v53 = vadd.f32 %v272_v51, %v270_v48  ;;  %1985 = vmatprep.subr.bf16.mxu1 %v4358_v45  ;;  %1904 = vmatpush1.bf16.msra.mxu0 %v4355_v46  ;;  %v423_v48 = vld [vmem:[#allocation7 + $0x400] sm:$0xff]  ;;  %v424_v51 = vld [vmem:[#allocation7 + $0x408] sm:$0xff]  ;;  %v4396_v45 = vcombine.high %v455_v36, %v459_v37 }
 0x12e   :  { %v427_v50 = vld [vmem:[#allocation7 + $0x420] sm:$0xff]  ;;  %v4398_v46 = vcombine.high %v456_v38, %v460_v39  ;;  %v504_v31 = vld [vmem:[#allocation7 + $0x688] sm:$0xff] }
 0x12f   :  { %265 = vadd.xlane.f32.xlu0 %v264_v52  ;;  %v274_v55 = vadd.f32 %v273_v53, %v271_v54  ;;  %1986 = vmatpush1.bf16.msra.mxu1 %v4357_v47  ;;  %v4364_v52 = vcombine.high %v423_v48, %v427_v50  ;;  %v428_v53 = vld [vmem:[#allocation7 + $0x428] sm:$0xff]  ;;  %v4363_v54 = vcombine.low %v423_v48, %v427_v50  ;;  %v463_v47 = vld [vmem:[#allocation7 + $0x540] sm:$0xff] }
 0x130   :  { %v4366_v56 = vcombine.high %v424_v51, %v428_v53  ;;  %v467_v48 = vld [vmem:[#allocation7 + $0x560] sm:$0xff]  ;;  %v464_v50 = vld [vmem:[#allocation7 + $0x548] sm:$0xff] }
 0x131   :  { %1914 = vmatprep.subr.bf16.mxu0 %v4364_v52  ;;  %v4395_v52 = vcombine.low %v455_v36, %v459_v37  ;;  %v503_v26 = vld [vmem:[#allocation7 + $0x680] sm:$0xff] }
 0x132   :  { %1996 = vmatprep.subr.bf16.mxu1 %v4366_v56  ;;  %v471_v56 = vld [vmem:[#allocation7 + $0x580] sm:$0xff] }
 0x133   :  { %275 = vadd.xlane.f32.xlu0 %v274_v55  ;;  %v4365_v55 = vcombine.low %v424_v51, %v428_v53  ;;  %v468_v51 = vld [vmem:[#allocation7 + $0x568] sm:$0xff]  ;;  %v4397_v53 = vcombine.low %v456_v38, %v460_v39  ;;  %v511_v37 = vld [vmem:[#allocation7 + $0x6c0] sm:$0xff] }
 0x134   :  { %v515_v38 = vld [vmem:[#allocation7 + $0x6e0] sm:$0xff]  ;;  %v512_v39 = vld [vmem:[#allocation7 + $0x6c8] sm:$0xff] }
 0x1bc   :  { %v266_v57 = vpop.xlane.xlu0 %265 }
 0x1bd   :  { %v267_v58 = vmul.f32 0.001953125, %v266_v57  ;;  %v475_v57 = vld [vmem:[#allocation7 + $0x5a0] sm:$0xff] }
 0x1bf   :  { %v278_v60 = vmul.f32 %v267_v58, %v267_v58  ;;  %v282_v1 = vsub.f32 %v5426_v42, %v267_v58  ;;  %v281_v2 = vsub.f32 %v5424_v41, %v267_v58  ;;  %v283_v3 = vsub.f32 %v5428_v43, %v267_v58  ;;  %v439_v42 = vld [vmem:[#allocation7 + $0x480] sm:$0xff] }
 0x1c0   :  { %v276_v59 = vpop.xlane.xlu0 %275  ;;  %v284_v5 = vsub.f32 %v5438_v49, %v267_v58  ;;  %v4372_v41 = vcombine.high %v431_v8, %v435_v11  ;;  %v4374_v43 = vcombine.high %v432_v12, %v436_v13  ;;  %v443_v49 = vld [vmem:[#allocation7 + $0x4a0] sm:$0xff]  ;;  %v472_v58 = vld [vmem:[#allocation7 + $0x588] sm:$0xff] }
 0x1c1   :  { %v277_v61 = vmul.f32 0.001953125, %v276_v59  ;;  %v4380_v21 = vcombine.high %v439_v42, %v443_v49  ;;  %v4379_v32 = vcombine.low %v439_v42, %v443_v49  ;;  %v476_v59 = vld [vmem:[#allocation7 + $0x5a8] sm:$0xff]  ;;  %v487_v8 = vld [vmem:[#allocation7 + $0x600] sm:$0xff] }
 0x1c2   :  { %v488_v11 = vld [vmem:[#allocation7 + $0x608] sm:$0xff]  ;;  %v495_v49 = vld [vmem:[#allocation7 + $0x640] sm:$0xff] }
 0x1c3   :  { %v279_v62 = vsub.f32 %v277_v61, %v278_v60  ;;  %v4403_v60 = vcombine.low %v463_v47, %v467_v48  ;;  %v4405_v61 = vcombine.low %v464_v50, %v468_v51  ;;  %v492_v12 = vld [vmem:[#allocation7 + $0x628] sm:$0xff] }
 0x1c5   :  { %v280_v63 = vmax.f32 %v279_v62, 0.0  ;;  %v4412_v62 = vcombine.high %v471_v56, %v475_v57 }
 0x1c7   :  { %v285_v0 = vadd.f32 1e-05, %v280_v63  ;;  %v4414_v63 = vcombine.high %v472_v58, %v476_v59 }
 0x1c9   :  { %5193 = vrsqrt.f32 %v285_v0  ;;  %v479_v0 = vld [vmem:[#allocation7 + $0x5c0] sm:$0xff] }
 0x1d3   :  { %v5194_v4 = vpop.eup %5193 }
 0x1d4   :  { %v288_v6 = vmul.f32 %v5194_v4, %v282_v1  ;;  %v287_v7 = vmul.f32 %v5194_v4, %v281_v2  ;;  %v5448_v9 = vmul.f32 %v5194_v4, %v283_v3  ;;  %v290_v10 = vmul.f32 %v5194_v4, %v284_v5  ;;  %v483_v1 = vld [vmem:[#allocation7 + $0x5e0] sm:$0xff]  ;;  %v480_v2 = vld [vmem:[#allocation7 + $0x5c8] sm:$0xff] }
 0x1d5   :  { %v484_v3 = vld [vmem:[#allocation7 + $0x5e8] sm:$0xff]  ;;  %v4411_v4 = vcombine.low %v471_v56, %v475_v57  ;;  %v4413_v5 = vcombine.low %v472_v58, %v476_v59  ;;  %v4419_v13 = vcombine.low %v479_v0, %v483_v1  ;;  %v527_v57 = vld [vmem:[#allocation7 + $0x740] sm:$0xff] }
 0x1d6   :  { %v5450_v14 = vpack.c.bf16 %v288_v6, %v288_v6  ;;  %v5452_v15 = vpack.c.bf16 %v287_v7, %v287_v7  ;;  %v5458_v18 = vpack.c.bf16 %v290_v10, %v290_v10  ;;  %v4420_v6 = vcombine.high %v479_v0, %v483_v1  ;;  %v491_v10 = vld [vmem:[#allocation7 + $0x620] sm:$0xff]  ;;  %v528_v59 = vld [vmem:[#allocation7 + $0x748] sm:$0xff] }
 0x1d7   :  { %v4422_v7 = vcombine.high %v480_v2, %v484_v3  ;;  %v4421_v42 = vcombine.low %v480_v2, %v484_v3  ;;  %v531_v58 = vld [vmem:[#allocation7 + $0x760] sm:$0xff]  ;;  %v536_v3 = vld [vmem:[#allocation7 + $0x788] sm:$0xff] }
 0x1d8   :  { %1905 = vmatprep.mubr.bf16.mxu0 %v5450_v14  ;;  %1987 = vmatprep.mubr.bf16.mxu1 %v5450_v14  ;;  %v535_v1 = vld [vmem:[#allocation7 + $0x780] sm:$0xff] }
 0x1d9   :  { %1906 = vmatmul.mubr.bf16.vlgmr.msra.gmra.mrb[4].mxu0 %v5452_v15  ;;  %1988 = vmatmul.mubr.bf16.vlgmr.msra.gmra.mrb[4].mxu1 %v5452_v15  ;;  %v539_v2 = vld [vmem:[#allocation7 + $0x7a0] sm:$0xff] }
 0x1da   :  { %1915 = vmatpush1.bf16.msra.mxu0 %v4363_v54  ;;  %1997 = vmatpush1.bf16.msra.mxu1 %v4365_v55  ;;  %v4404_v54 = vcombine.high %v463_v47, %v467_v48  ;;  %v4406_v55 = vcombine.high %v464_v50, %v468_v51  ;;  %v519_v48 = vld [vmem:[#allocation7 + $0x700] sm:$0xff]  ;;  %v520_v51 = vld [vmem:[#allocation7 + $0x708] sm:$0xff] }
 0x1db   :  { %1946 = vmatprep.mubr.bf16.mxu0 %v5458_v18  ;;  %2028 = vmatprep.mubr.bf16.mxu1 %v5458_v18  ;;  %v523_v50 = vld [vmem:[#allocation7 + $0x720] sm:$0xff] }
 0x1dc   :  { %1916 = vmatprep.subr.bf16.mxu0 %v4372_v41  ;;  %1998 = vmatprep.subr.bf16.mxu1 %v4374_v43  ;;  %v4428_v41 = vcombine.high %v487_v8, %v491_v10  ;;  %v4430_v43 = vcombine.high %v488_v11, %v492_v12 }
 0x1de   :  { %1917 = vmatpush1.bf16.msra.mxu0 %v4371_v19  ;;  %1999 = vmatpush1.bf16.msra.mxu1 %v4373_v20  ;;  %v500_v19 = vld [vmem:[#allocation7 + $0x668] sm:$0xff]  ;;  %v4427_v20 = vcombine.low %v487_v8, %v491_v10  ;;  %v543_v10 = vld [vmem:[#allocation7 + $0x7c0] sm:$0xff] }
 0x1df   :  { %1918 = vmatprep.subr.bf16.mxu0 %v4380_v21  ;;  %2000 = vmatprep.subr.bf16.mxu1 %v4382_v22  ;;  %v4429_v21 = vcombine.low %v488_v11, %v492_v12  ;;  %v4436_v22 = vcombine.high %v495_v49, %v499_v16  ;;  %v4438_v23 = vcombine.high %v496_v17, %v500_v19  ;;  %v547_v11 = vld [vmem:[#allocation7 + $0x7e0] sm:$0xff]  ;;  %v544_v12 = vld [vmem:[#allocation7 + $0x7c8] sm:$0xff] }
 0x1e2   :  { %1919 = vmatpush1.bf16.msra.mxu0 %v4379_v32  ;;  %2001 = vmatpush1.bf16.msra.mxu1 %v4381_v33  ;;  %v508_v32 = vld [vmem:[#allocation7 + $0x6a8] sm:$0xff]  ;;  %v4435_v33 = vcombine.low %v495_v49, %v499_v16  ;;  %v297_v16 = vld [vmem:[#allocation7 + $0x10] sm:$0xff] }
 0x1e3   :  { %1920 = vmatprep.subr.bf16.mxu0 %v4388_v34  ;;  %2002 = vmatprep.subr.bf16.mxu1 %v4390_v35  ;;  %v4437_v34 = vcombine.low %v496_v17, %v500_v19  ;;  %v4444_v35 = vcombine.high %v503_v26, %v507_v30  ;;  %v4446_v36 = vcombine.high %v504_v31, %v508_v32  ;;  %v301_v17 = vld [vmem:[#allocation7 + $0x30] sm:$0xff]  ;;  %v298_v19 = vld [vmem:[#allocation7 + $0x18] sm:$0xff] }
 0x1e6   :  { %1921 = vmatpush1.bf16.msra.mxu0 %v4387_v40  ;;  %2003 = vmatpush1.bf16.msra.mxu1 %v4389_v44  ;;  %v516_v40 = vld [vmem:[#allocation7 + $0x6e8] sm:$0xff]  ;;  %v4443_v44 = vcombine.low %v503_v26, %v507_v30  ;;  %v305_v30 = vld [vmem:[#allocation7 + $0x50] sm:$0xff] }
 0x1e7   :  { %1922 = vmatprep.subr.bf16.mxu0 %v4396_v45  ;;  %2004 = vmatprep.subr.bf16.mxu1 %v4398_v46  ;;  %v4445_v45 = vcombine.low %v504_v31, %v508_v32  ;;  %v4452_v46 = vcombine.high %v511_v37, %v515_v38  ;;  %v4454_v47 = vcombine.high %v512_v39, %v516_v40  ;;  %v309_v31 = vld [vmem:[#allocation7 + $0x70] sm:$0xff]  ;;  %v306_v32 = vld [vmem:[#allocation7 + $0x58] sm:$0xff] }
 0x1ea   :  { %1923 = vmatpush1.bf16.msra.mxu0 %v4395_v52  ;;  %2005 = vmatpush1.bf16.msra.mxu1 %v4397_v53  ;;  %v524_v52 = vld [vmem:[#allocation7 + $0x728] sm:$0xff]  ;;  %v4451_v53 = vcombine.low %v511_v37, %v515_v38  ;;  %v4248_v37 = vcombine.high %v305_v30, %v309_v31 }
 0x1eb   :  { %1924 = vmatprep.subr.bf16.mxu0 %v4404_v54  ;;  %2006 = vmatprep.subr.bf16.mxu1 %v4406_v55  ;;  %v4453_v54 = vcombine.low %v512_v39, %v516_v40  ;;  %v4460_v55 = vcombine.high %v519_v48, %v523_v50  ;;  %v4462_v56 = vcombine.high %v520_v51, %v524_v52  ;;  %v313_v39 = vld [vmem:[#allocation7 + $0x90] sm:$0xff] }
 0x1ec   :  { %v317_v40 = vld [vmem:[#allocation7 + $0xb0] sm:$0xff] }
 0x1ee   :  { %1925 = vmatpush1.bf16.msra.mxu0 %v4403_v60  ;;  %2007 = vmatpush1.bf16.msra.mxu1 %v4405_v61  ;;  %v532_v60 = vld [vmem:[#allocation7 + $0x768] sm:$0xff]  ;;  %v4459_v61 = vcombine.low %v519_v48, %v523_v50  ;;  %v321_v50 = vld [vmem:[#allocation7 + $0xd0] sm:$0xff] }
 0x1ef   :  { %1926 = vmatprep.subr.bf16.mxu0 %v4412_v62  ;;  %2008 = vmatprep.subr.bf16.mxu1 %v4414_v63  ;;  %v4461_v62 = vcombine.low %v520_v51, %v524_v52  ;;  %v4468_v63 = vcombine.high %v527_v57, %v531_v58  ;;  %v4470_v0 = vcombine.high %v528_v59, %v532_v60  ;;  %v325_v51 = vld [vmem:[#allocation7 + $0xf0] sm:$0xff]  ;;  %v322_v52 = vld [vmem:[#allocation7 + $0xd8] sm:$0xff] }
 0x1f2   :  { %1927 = vmatpush1.bf16.msra.mxu0 %v4411_v4  ;;  %2009 = vmatpush1.bf16.msra.mxu1 %v4413_v5  ;;  %v540_v4 = vld [vmem:[#allocation7 + $0x7a8] sm:$0xff]  ;;  %v4467_v5 = vcombine.low %v527_v57, %v531_v58  ;;  %v329_v58 = vld [vmem:[#allocation7 + $0x110] sm:$0xff] }
 0x1f3   :  { %1928 = vmatprep.subr.bf16.mxu0 %v4420_v6  ;;  %2010 = vmatprep.subr.bf16.mxu1 %v4422_v7  ;;  %v4469_v6 = vcombine.low %v528_v59, %v532_v60  ;;  %v4476_v7 = vcombine.high %v535_v1, %v539_v2  ;;  %v4478_v8 = vcombine.high %v536_v3, %v540_v4  ;;  %v333_v59 = vld [vmem:[#allocation7 + $0x130] sm:$0xff]  ;;  %v334_v60 = vld [vmem:[#allocation7 + $0x138] sm:$0xff] }
 0x1f6   :  { %1929 = vmatpush1.bf16.msra.mxu0 %v4419_v13  ;;  %2011 = vmatpush1.bf16.msra.mxu1 %v4421_v42  ;;  %v548_v13 = vld [vmem:[#allocation7 + $0x7e8] sm:$0xff]  ;;  %v4475_v42 = vcombine.low %v535_v1, %v539_v2  ;;  %v337_v1 = vld [vmem:[#allocation7 + $0x150] sm:$0xff] }
 0x1f7   :  { %1930 = vmatprep.subr.bf16.mxu0 %v4428_v41  ;;  %2012 = vmatprep.subr.bf16.mxu1 %v4430_v43  ;;  %v4477_v41 = vcombine.low %v536_v3, %v540_v4  ;;  %v4484_v43 = vcombine.high %v543_v10, %v547_v11  ;;  %v4486_v49 = vcombine.high %v544_v12, %v548_v13  ;;  %v341_v2 = vld [vmem:[#allocation7 + $0x170] sm:$0xff]  ;;  %v338_v3 = vld [vmem:[#allocation7 + $0x158] sm:$0xff] }
 0x1f8   :  { %v342_v4 = vld [vmem:[#allocation7 + $0x178] sm:$0xff] }
 0x1fa   :  { %1931 = vmatpush1.bf16.msra.mxu0 %v4427_v20  ;;  %2013 = vmatpush1.bf16.msra.mxu1 %v4429_v21  ;;  %v302_v20 = vld [vmem:[#allocation7 + $0x38] sm:$0xff]  ;;  %v4483_v21 = vcombine.low %v543_v10, %v547_v11  ;;  %v345_v10 = vld [vmem:[#allocation7 + $0x190] sm:$0xff] }
 0x1fb   :  { %1932 = vmatprep.subr.bf16.mxu0 %v4436_v22  ;;  %2014 = vmatprep.subr.bf16.mxu1 %v4438_v23  ;;  %v4485_v22 = vcombine.low %v544_v12, %v548_v13  ;;  %v4240_v23 = vcombine.high %v297_v16, %v301_v17  ;;  %v4242_v26 = vcombine.high %v298_v19, %v302_v20  ;;  %v349_v11 = vld [vmem:[#allocation7 + $0x1b0] sm:$0xff]  ;;  %v346_v12 = vld [vmem:[#allocation7 + $0x198] sm:$0xff] }
 0x1fc   :  { %v350_v13 = vld [vmem:[#allocation7 + $0x1b8] sm:$0xff] }
 0x1fe   :  { %1933 = vmatpush1.bf16.msra.mxu0 %v4435_v33  ;;  %2015 = vmatpush1.bf16.msra.mxu1 %v4437_v34  ;;  %v310_v33 = vld [vmem:[#allocation7 + $0x78] sm:$0xff]  ;;  %v4239_v34 = vcombine.low %v297_v16, %v301_v17  ;;  %v353_v16 = vld [vmem:[#allocation7 + $0x1d0] sm:$0xff] }
 0x1ff   :  { %1934 = vmatprep.subr.bf16.mxu0 %v4444_v35  ;;  %2016 = vmatprep.subr.bf16.mxu1 %v4446_v36  ;;  %v5464_v35 = vpack.c.bf16 %v5448_v9, %v5448_v9  ;;  %v4241_v36 = vcombine.low %v298_v19, %v302_v20  ;;  %v4250_v38 = vcombine.high %v306_v32, %v310_v33  ;;  %v357_v17 = vld [vmem:[#allocation7 + $0x1f0] sm:$0xff]  ;;  %v354_v19 = vld [vmem:[#allocation7 + $0x1d8] sm:$0xff] }
 0x200   :  { %v4249_v9 = vcombine.low %v306_v32, %v310_v33  ;;  %v358_v20 = vld [vmem:[#allocation7 + $0x1f8] sm:$0xff] }
 0x201   :  { %v362_v32 = vld [vmem:[#allocation7 + $0x218] sm:$0xff] }
 0x202   :  { %1935 = vmatpush1.bf16.msra.mxu0 %v4443_v44  ;;  %2017 = vmatpush1.bf16.msra.mxu1 %v4445_v45  ;;  %v314_v44 = vld [vmem:[#allocation7 + $0x98] sm:$0xff] }
 0x203   :  { %1936 = vmatprep.subr.bf16.mxu0 %v4452_v46  ;;  %2018 = vmatprep.subr.bf16.mxu1 %v4454_v47  ;;  %v318_v45 = vld [vmem:[#allocation7 + $0xb8] sm:$0xff]  ;;  %v4247_v46 = vcombine.low %v305_v30, %v309_v31  ;;  %v4256_v47 = vcombine.high %v313_v39, %v317_v40  ;;  %v361_v30 = vld [vmem:[#allocation7 + $0x210] sm:$0xff] }
 0x204   :  { %v4258_v48 = vcombine.high %v314_v44, %v318_v45  ;;  %v365_v31 = vld [vmem:[#allocation7 + $0x230] sm:$0xff]  ;;  %v366_v33 = vld [vmem:[#allocation7 + $0x238] sm:$0xff] }
 0x206   :  { %1937 = vmatpush1.bf16.msra.mxu0 %v4451_v53  ;;  %2019 = vmatpush1.bf16.msra.mxu1 %v4453_v54  ;;  %v326_v53 = vld [vmem:[#allocation7 + $0xf8] sm:$0xff]  ;;  %v4255_v54 = vcombine.low %v313_v39, %v317_v40  ;;  %v369_v39 = vld [vmem:[#allocation7 + $0x250] sm:$0xff] }
 0x207   :  { %1938 = vmatprep.subr.bf16.mxu0 %v4460_v55  ;;  %2020 = vmatprep.subr.bf16.mxu1 %v4462_v56  ;;  %v4257_v55 = vcombine.low %v314_v44, %v318_v45  ;;  %v4264_v56 = vcombine.high %v321_v50, %v325_v51  ;;  %v4266_v57 = vcombine.high %v322_v52, %v326_v53  ;;  %v373_v40 = vld [vmem:[#allocation7 + $0x270] sm:$0xff]  ;;  %v370_v44 = vld [vmem:[#allocation7 + $0x258] sm:$0xff] }
 0x208   :  { %v374_v45 = vld [vmem:[#allocation7 + $0x278] sm:$0xff] }
 0x20a   :  { %1939 = vmatpush1.bf16.msra.mxu0 %v4459_v61  ;;  %2021 = vmatpush1.bf16.msra.mxu1 %v4461_v62  ;;  %v4263_v61 = vcombine.low %v321_v50, %v325_v51  ;;  %v4265_v62 = vcombine.low %v322_v52, %v326_v53  ;;  %v377_v50 = vld [vmem:[#allocation7 + $0x290] sm:$0xff]  ;;  %v378_v52 = vld [vmem:[#allocation7 + $0x298] sm:$0xff] }
 0x20b   :  { %1940 = vmatprep.subr.bf16.mxu0 %v4468_v63  ;;  %2022 = vmatprep.subr.bf16.mxu1 %v4470_v0  ;;  %v4272_v63 = vcombine.high %v329_v58, %v333_v59  ;;  %v381_v51 = vld [vmem:[#allocation7 + $0x2b0] sm:$0xff]  ;;  %v382_v53 = vld [vmem:[#allocation7 + $0x2b8] sm:$0xff] }
 0x20e   :  { %1941 = vmatpush1.bf16.msra.mxu0 %v4467_v5  ;;  %2023 = vmatpush1.bf16.msra.mxu1 %v4469_v6  ;;  %v4271_v5 = vcombine.low %v329_v58, %v333_v59  ;;  %v385_v58 = vld [vmem:[#allocation7 + $0x2d0] sm:$0xff] }
 0x20f   :  { %1942 = vmatprep.subr.bf16.mxu0 %v4476_v7  ;;  %2024 = vmatprep.subr.bf16.mxu1 %v4478_v8  ;;  %v4280_v7 = vcombine.high %v337_v1, %v341_v2  ;;  %v4282_v8 = vcombine.high %v338_v3, %v342_v4  ;;  %v389_v59 = vld [vmem:[#allocation7 + $0x2f0] sm:$0xff] }
 0x212   :  { %1943 = vmatpush1.bf16.msra.mxu0 %v4475_v42  ;;  %2025 = vmatpush1.bf16.msra.mxu1 %v4477_v41  ;;  %v4279_v42 = vcombine.low %v337_v1, %v341_v2  ;;  %v4281_v41 = vcombine.low %v338_v3, %v342_v4  ;;  %v393_v1 = vld [vmem:[#allocation7 + $0x310] sm:$0xff]  ;;  %v394_v3 = vld [vmem:[#allocation7 + $0x318] sm:$0xff] }
 0x213   :  { %1944 = vmatprep.subr.bf16.mxu0 %v4484_v43  ;;  %2026 = vmatprep.subr.bf16.mxu1 %v4486_v49  ;;  %v4288_v43 = vcombine.high %v345_v10, %v349_v11  ;;  %v4290_v49 = vcombine.high %v346_v12, %v350_v13  ;;  %v397_v2 = vld [vmem:[#allocation7 + $0x330] sm:$0xff]  ;;  %v398_v4 = vld [vmem:[#allocation7 + $0x338] sm:$0xff] }
 0x216   :  { %1945 = vmatpush1.bf16.msra.mxu0 %v4483_v21  ;;  %2027 = vmatpush1.bf16.msra.mxu1 %v4485_v22  ;;  %v4287_v21 = vcombine.low %v345_v10, %v349_v11  ;;  %v4289_v22 = vcombine.low %v346_v12, %v350_v13  ;;  %v401_v10 = vld [vmem:[#allocation7 + $0x350] sm:$0xff]  ;;  %v402_v12 = vld [vmem:[#allocation7 + $0x358] sm:$0xff] }
 0x217   :  { %2037 = vmatprep.subr.bf16.mxu0 %v4240_v23  ;;  %2119 = vmatprep.subr.bf16.mxu1 %v4242_v26  ;;  %v4296_v23 = vcombine.high %v353_v16, %v357_v17  ;;  %v4298_v26 = vcombine.high %v354_v19, %v358_v20  ;;  %v405_v11 = vld [vmem:[#allocation7 + $0x370] sm:$0xff]  ;;  %v406_v13 = vld [vmem:[#allocation7 + $0x378] sm:$0xff] }
 0x219   :  { %1947 = vmatmul.mubr.bf16.vlgmr.msra.gmra.mrb[4].mxu0 %v5464_v35  ;;  %2029 = vmatmul.mubr.bf16.vlgmr.msra.gmra.mrb[4].mxu1 %v5464_v35 }
 0x21a   :  { %2038 = vmatpush1.bf16.msra.mxu0 %v4239_v34  ;;  %2069 = vmatprep.mubr.bf16.mxu0 %v5450_v14  ;;  %v4295_v34 = vcombine.low %v353_v16, %v357_v17  ;;  %v409_v16 = vld [vmem:[#allocation7 + $0x390] sm:$0xff] }
 0x21b   :  { %2120 = vmatpush1.bf16.msra.mxu1 %v4241_v36  ;;  %2151 = vmatprep.mubr.bf16.mxu1 %v5450_v14  ;;  %v330_v14 = vld [vmem:[#allocation7 + $0x118] sm:$0xff]  ;;  %v4297_v36 = vcombine.low %v354_v19, %v358_v20  ;;  %v413_v17 = vld [vmem:[#allocation7 + $0x3b0] sm:$0xff] }
 0x21c   :  { %2039 = vmatprep.subr.bf16.mxu0 %v4248_v37  ;;  %2121 = vmatprep.subr.bf16.mxu1 %v4250_v38  ;;  %v4274_v0 = vcombine.high %v330_v14, %v334_v60  ;;  %v4273_v6 = vcombine.low %v330_v14, %v334_v60  ;;  %v4304_v37 = vcombine.high %v361_v30, %v365_v31  ;;  %v386_v14 = vld [vmem:[#allocation7 + $0x2d8] sm:$0xff] }
 0x21d   :  { %v4306_v38 = vcombine.high %v362_v32, %v366_v33  ;;  %v390_v60 = vld [vmem:[#allocation7 + $0x2f8] sm:$0xff] }
 0x21e   :  { %2040 = vmatpush1.bf16.msra.mxu0 %v4247_v46  ;;  %v4303_v46 = vcombine.low %v361_v30, %v365_v31  ;;  %v410_v19 = vld [vmem:[#allocation7 + $0x398] sm:$0xff]  ;;  %v417_v30 = vld [vmem:[#allocation7 + $0x3d0] sm:$0xff] }
 0x21f   :  { %2122 = vmatpush1.bf16.msra.mxu1 %v4249_v9  ;;  %2041 = vmatprep.subr.bf16.mxu0 %v4256_v47  ;;  %v4305_v9 = vcombine.low %v362_v32, %v366_v33  ;;  %v4312_v47 = vcombine.high %v369_v39, %v373_v40  ;;  %v414_v20 = vld [vmem:[#allocation7 + $0x3b8] sm:$0xff]  ;;  %v421_v31 = vld [vmem:[#allocation7 + $0x3f0] sm:$0xff] }
 0x220   :  { %2123 = vmatprep.subr.bf16.mxu1 %v4258_v48  ;;  %v4314_v48 = vcombine.high %v370_v44, %v374_v45  ;;  %v418_v32 = vld [vmem:[#allocation7 + $0x3d8] sm:$0xff] }
 0x221   :  { %v422_v33 = vld [vmem:[#allocation7 + $0x3f8] sm:$0xff] }
 0x222   :  { %2042 = vmatpush1.bf16.msra.mxu0 %v4255_v54  ;;  %v4311_v54 = vcombine.low %v369_v39, %v373_v40  ;;  %v425_v39 = vld [vmem:[#allocation7 + $0x410] sm:$0xff] }
 0x223   :  { %2124 = vmatpush1.bf16.msra.mxu1 %v4257_v55  ;;  %2043 = vmatprep.subr.bf16.mxu0 %v4264_v56  ;;  %v4313_v55 = vcombine.low %v370_v44, %v374_v45  ;;  %v4320_v56 = vcombine.high %v377_v50, %v381_v51  ;;  %v429_v40 = vld [vmem:[#allocation7 + $0x430] sm:$0xff]  ;;  %v426_v44 = vld [vmem:[#allocation7 + $0x418] sm:$0xff] }
 0x224   :  { %2125 = vmatprep.subr.bf16.mxu1 %v4266_v57  ;;  %v4322_v57 = vcombine.high %v378_v52, %v382_v53  ;;  %v430_v45 = vld [vmem:[#allocation7 + $0x438] sm:$0xff] }
 0x226   :  { %2044 = vmatpush1.bf16.msra.mxu0 %v4263_v61  ;;  %v4319_v61 = vcombine.low %v377_v50, %v381_v51  ;;  %v433_v50 = vld [vmem:[#allocation7 + $0x450] sm:$0xff] }
 0x227   :  { %2126 = vmatpush1.bf16.msra.mxu1 %v4265_v62  ;;  %2045 = vmatprep.subr.bf16.mxu0 %v4272_v63  ;;  %v4321_v62 = vcombine.low %v378_v52, %v382_v53  ;;  %v4328_v63 = vcombine.high %v385_v58, %v389_v59  ;;  %v437_v51 = vld [vmem:[#allocation7 + $0x470] sm:$0xff]  ;;  %v4367_v52 = vcombine.low %v425_v39, %v429_v40  ;;  %v434_v53 = vld [vmem:[#allocation7 + $0x458] sm:$0xff] }
 0x228   :  { %2127 = vmatprep.subr.bf16.mxu1 %v4274_v0  ;;  %v4330_v0 = vcombine.high %v386_v14, %v390_v60 }
 0x22a   :  { %2046 = vmatpush1.bf16.msra.mxu0 %v4271_v5  ;;  %v4327_v5 = vcombine.low %v385_v58, %v389_v59  ;;  %v445_v58 = vld [vmem:[#allocation7 + $0x4b0] sm:$0xff] }
 0x22b   :  { %2128 = vmatpush1.bf16.msra.mxu1 %v4273_v6  ;;  %2047 = vmatprep.subr.bf16.mxu0 %v4280_v7  ;;  %v4329_v6 = vcombine.low %v386_v14, %v390_v60  ;;  %v4336_v7 = vcombine.high %v393_v1, %v397_v2  ;;  %v442_v14 = vld [vmem:[#allocation7 + $0x498] sm:$0xff] }
 0x22c   :  { %2129 = vmatprep.subr.bf16.mxu1 %v4282_v8  ;;  %v4338_v8 = vcombine.high %v394_v3, %v398_v4  ;;  %v446_v60 = vld [vmem:[#allocation7 + $0x4b8] sm:$0xff] }
 0x22e   :  { %2048 = vmatpush1.bf16.msra.mxu0 %v4279_v42  ;;  %v4335_v42 = vcombine.low %v393_v1, %v397_v2  ;;  %v449_v1 = vld [vmem:[#allocation7 + $0x4d0] sm:$0xff] }
 0x22f   :  { %2130 = vmatpush1.bf16.msra.mxu1 %v4281_v41  ;;  %2049 = vmatprep.subr.bf16.mxu0 %v4288_v43  ;;  %v4337_v41 = vcombine.low %v394_v3, %v398_v4  ;;  %v4344_v43 = vcombine.high %v401_v10, %v405_v11  ;;  %v453_v2 = vld [vmem:[#allocation7 + $0x4f0] sm:$0xff]  ;;  %v450_v3 = vld [vmem:[#allocation7 + $0x4d8] sm:$0xff] }
 0x230   :  { %2131 = vmatprep.subr.bf16.mxu1 %v4290_v49  ;;  %v4346_v49 = vcombine.high %v402_v12, %v406_v13  ;;  %v454_v4 = vld [vmem:[#allocation7 + $0x4f8] sm:$0xff] }
 0x232   :  { %2050 = vmatpush1.bf16.msra.mxu0 %v4287_v21  ;;  %v4343_v21 = vcombine.low %v401_v10, %v405_v11  ;;  %v461_v10 = vld [vmem:[#allocation7 + $0x530] sm:$0xff]  ;;  %v458_v11 = vld [vmem:[#allocation7 + $0x518] sm:$0xff] }
 0x233   :  { %2132 = vmatpush1.bf16.msra.mxu1 %v4289_v22  ;;  %2051 = vmatprep.subr.bf16.mxu0 %v4296_v23  ;;  %v4345_v22 = vcombine.low %v402_v12, %v406_v13  ;;  %v4352_v23 = vcombine.high %v409_v16, %v413_v17  ;;  %v462_v12 = vld [vmem:[#allocation7 + $0x538] sm:$0xff]  ;;  %v4393_v13 = vcombine.low %v450_v3, %v454_v4 }
 0x234   :  { %2133 = vmatprep.subr.bf16.mxu1 %v4298_v26  ;;  %v4354_v26 = vcombine.high %v410_v19, %v414_v20 }
 0x236   :  { %2052 = vmatpush1.bf16.msra.mxu0 %v4295_v34  ;;  %v4351_v34 = vcombine.low %v409_v16, %v413_v17  ;;  %v466_v16 = vld [vmem:[#allocation7 + $0x558] sm:$0xff] }
 0x237   :  { %2134 = vmatpush1.bf16.msra.mxu1 %v4297_v36  ;;  %2053 = vmatprep.subr.bf16.mxu0 %v4304_v37  ;;  %v4353_v36 = vcombine.low %v410_v19, %v414_v20  ;;  %v4360_v37 = vcombine.high %v417_v30, %v421_v31  ;;  %v470_v17 = vld [vmem:[#allocation7 + $0x578] sm:$0xff]  ;;  %v4401_v20 = vcombine.low %v458_v11, %v462_v12 }
 0x238   :  { %2135 = vmatprep.subr.bf16.mxu1 %v4306_v38  ;;  %v4362_v38 = vcombine.high %v418_v32, %v422_v33 }
 0x23a   :  { %2054 = vmatpush1.bf16.msra.mxu0 %v4303_v46  ;;  %v4359_v46 = vcombine.low %v417_v30, %v421_v31  ;;  %v474_v30 = vld [vmem:[#allocation7 + $0x598] sm:$0xff] }
 0x23b   :  { %2136 = vmatpush1.bf16.msra.mxu1 %v4305_v9  ;;  %2055 = vmatprep.subr.bf16.mxu0 %v4312_v47  ;;  %v4361_v9 = vcombine.low %v418_v32, %v422_v33  ;;  %v4368_v47 = vcombine.high %v425_v39, %v429_v40  ;;  %v478_v31 = vld [vmem:[#allocation7 + $0x5b8] sm:$0xff]  ;;  %v4409_v33 = vcombine.low %v466_v16, %v470_v17 }
 0x23c   :  { %2137 = vmatprep.subr.bf16.mxu1 %v4314_v48  ;;  %v4370_v48 = vcombine.high %v426_v44, %v430_v45  ;;  %v482_v39 = vld [vmem:[#allocation7 + $0x5d8] sm:$0xff] }
 0x23d   :  { %v486_v40 = vld [vmem:[#allocation7 + $0x5f8] sm:$0xff] }
 0x23e   :  { %2056 = vmatpush1.bf16.msra.mxu0 %v4311_v54  ;;  %v438_v54 = vld [vmem:[#allocation7 + $0x478] sm:$0xff] }
 0x23f   :  { %2138 = vmatpush1.bf16.msra.mxu1 %v4313_v55  ;;  %2057 = vmatprep.subr.bf16.mxu0 %v4320_v56  ;;  %v4369_v55 = vcombine.low %v426_v44, %v430_v45  ;;  %v4376_v56 = vcombine.high %v433_v50, %v437_v51  ;;  %v4378_v59 = vcombine.high %v434_v53, %v438_v54 }
 0x240   :  { %2139 = vmatprep.subr.bf16.mxu1 %v4322_v57  ;;  %v441_v57 = vld [vmem:[#allocation7 + $0x490] sm:$0xff]  ;;  %v4417_v45 = vcombine.low %v474_v30, %v478_v31 }
 0x242   :  { %2058 = vmatpush1.bf16.msra.mxu0 %v4319_v61  ;;  %v4375_v61 = vcombine.low %v433_v50, %v437_v51  ;;  %v490_v50 = vld [vmem:[#allocation7 + $0x618] sm:$0xff] }
 0x243   :  { %2140 = vmatpush1.bf16.msra.mxu1 %v4321_v62  ;;  %2059 = vmatprep.subr.bf16.mxu0 %v4328_v63  ;;  %v4377_v62 = vcombine.low %v434_v53, %v438_v54  ;;  %v4384_v63 = vcombine.high %v441_v57, %v445_v58  ;;  %v494_v51 = vld [vmem:[#allocation7 + $0x638] sm:$0xff]  ;;  %v4425_v53 = vcombine.low %v482_v39, %v486_v40 }
 0x244   :  { %2141 = vmatprep.subr.bf16.mxu1 %v4330_v0  ;;  %v4386_v0 = vcombine.high %v442_v14, %v446_v60 }
 0x246   :  { %2060 = vmatpush1.bf16.msra.mxu0 %v4327_v5  ;;  %v4383_v5 = vcombine.low %v441_v57, %v445_v58  ;;  %v501_v57 = vld [vmem:[#allocation7 + $0x670] sm:$0xff]  ;;  %v498_v58 = vld [vmem:[#allocation7 + $0x658] sm:$0xff] }
 0x247   :  { %2142 = vmatpush1.bf16.msra.mxu1 %v4329_v6  ;;  %2061 = vmatprep.subr.bf16.mxu0 %v4336_v7  ;;  %v4392_v6 = vcombine.high %v449_v1, %v453_v2  ;;  %v4394_v7 = vcombine.high %v450_v3, %v454_v4 }
 0x248   :  { %2143 = vmatprep.subr.bf16.mxu1 %v4338_v8  ;;  %v457_v8 = vld [vmem:[#allocation7 + $0x510] sm:$0xff] }
 0x249   :  { %v4399_v19 = vcombine.low %v457_v8, %v461_v10 }
 0x24a   :  { %2062 = vmatpush1.bf16.msra.mxu0 %v4335_v42  ;;  %v4400_v42 = vcombine.high %v457_v8, %v461_v10  ;;  %v514_v8 = vld [vmem:[#allocation7 + $0x6d8] sm:$0xff] }
 0x24b   :  { %2144 = vmatpush1.bf16.msra.mxu1 %v4337_v41  ;;  %2063 = vmatprep.subr.bf16.mxu0 %v4344_v43  ;;  %v4402_v41 = vcombine.high %v458_v11, %v462_v12  ;;  %v465_v43 = vld [vmem:[#allocation7 + $0x550] sm:$0xff]  ;;  %v518_v10 = vld [vmem:[#allocation7 + $0x6f8] sm:$0xff] }
 0x24c   :  { %2145 = vmatprep.subr.bf16.mxu1 %v4346_v49  ;;  %v469_v49 = vld [vmem:[#allocation7 + $0x570] sm:$0xff] }
 0x24d   :  { %v4407_v32 = vcombine.low %v465_v43, %v469_v49 }
 0x24e   :  { %2064 = vmatpush1.bf16.msra.mxu0 %v4343_v21  ;;  %v4408_v21 = vcombine.high %v465_v43, %v469_v49  ;;  %v522_v43 = vld [vmem:[#allocation7 + $0x718] sm:$0xff] }
 0x24f   :  { %2146 = vmatpush1.bf16.msra.mxu1 %v4345_v22  ;;  %2065 = vmatprep.subr.bf16.mxu0 %v4352_v23  ;;  %v4410_v22 = vcombine.high %v466_v16, %v470_v17  ;;  %v473_v23 = vld [vmem:[#allocation7 + $0x590] sm:$0xff]  ;;  %v526_v49 = vld [vmem:[#allocation7 + $0x738] sm:$0xff]  ;;  %v4457_v17 = vcombine.low %v514_v8, %v518_v10 }
 0x250   :  { %2147 = vmatprep.subr.bf16.mxu1 %v4354_v26  ;;  %v477_v26 = vld [vmem:[#allocation7 + $0x5b0] sm:$0xff] }
 0x251   :  { %v4415_v44 = vcombine.low %v473_v23, %v477_v26 }
 0x252   :  { %2066 = vmatpush1.bf16.msra.mxu0 %v4351_v34  ;;  %v4416_v34 = vcombine.high %v473_v23, %v477_v26  ;;  %v530_v23 = vld [vmem:[#allocation7 + $0x758] sm:$0xff] }
 0x253   :  { %2148 = vmatpush1.bf16.msra.mxu1 %v4353_v36  ;;  %2067 = vmatprep.subr.bf16.mxu0 %v4360_v37  ;;  %v4418_v36 = vcombine.high %v474_v30, %v478_v31  ;;  %v481_v37 = vld [vmem:[#allocation7 + $0x5d0] sm:$0xff]  ;;  %v534_v26 = vld [vmem:[#allocation7 + $0x778] sm:$0xff]  ;;  %v4465_v31 = vcombine.low %v522_v43, %v526_v49 }
 0x254   :  { %2149 = vmatprep.subr.bf16.mxu1 %v4362_v38  ;;  %v485_v38 = vld [vmem:[#allocation7 + $0x5f0] sm:$0xff] }
 0x256   :  { %2068 = vmatpush1.bf16.msra.mxu0 %v4359_v46  ;;  %v4424_v46 = vcombine.high %v481_v37, %v485_v38 }
 0x257   :  { %2150 = vmatpush1.bf16.msra.mxu1 %v4361_v9  ;;  %2078 = vmatprep.subr.bf16.mxu0 %v4368_v47  ;;  %v4426_v9 = vcombine.high %v482_v39, %v486_v40  ;;  %v489_v47 = vld [vmem:[#allocation7 + $0x610] sm:$0xff]  ;;  %v4473_v40 = vcombine.low %v530_v23, %v534_v26 }
 0x258   :  { %2160 = vmatprep.subr.bf16.mxu1 %v4370_v48  ;;  %v493_v48 = vld [vmem:[#allocation7 + $0x630] sm:$0xff] }
 0x259   :  { %2070 = vmatmul.mubr.bf16.vlgmr.msra.gmra.mrb[8].mxu0 %v5452_v15  ;;  %v4432_v54 = vcombine.high %v489_v47, %v493_v48 }
 0x25a   :  { %2152 = vmatmul.mubr.bf16.vlgmr.msra.gmra.mrb[8].mxu1 %v5452_v15  ;;  %2079 = vmatpush1.bf16.msra.mxu0 %v4367_v52  ;;  %v4385_v15 = vcombine.low %v442_v14, %v446_v60  ;;  %v4423_v52 = vcombine.low %v481_v37, %v485_v38  ;;  %v4431_v14 = vcombine.low %v489_v47, %v493_v48  ;;  %v538_v37 = vld [vmem:[#allocation7 + $0x798] sm:$0xff] }
 0x25b   :  { %2110 = vmatprep.mubr.bf16.mxu0 %v5458_v18  ;;  %2161 = vmatpush1.bf16.msra.mxu1 %v4369_v55  ;;  %v4434_v55 = vcombine.high %v490_v50, %v494_v51  ;;  %v4433_v60 = vcombine.low %v490_v50, %v494_v51  ;;  %v542_v38 = vld [vmem:[#allocation7 + $0x7b8] sm:$0xff] }
 0x25c   :  { %2192 = vmatprep.mubr.bf16.mxu1 %v5458_v18  ;;  %2080 = vmatprep.subr.bf16.mxu0 %v4376_v56  ;;  %v4391_v18 = vcombine.low %v449_v1, %v453_v2  ;;  %v497_v56 = vld [vmem:[#allocation7 + $0x650] sm:$0xff]  ;;  %v506_v1 = vld [vmem:[#allocation7 + $0x698] sm:$0xff]  ;;  %v4481_v51 = vcombine.low %v538_v37, %v542_v38 }
 0x25d   :  { %2162 = vmatprep.subr.bf16.mxu1 %v4378_v59  ;;  %v502_v59 = vld [vmem:[#allocation7 + $0x678] sm:$0xff]  ;;  %v4439_v3 = vcombine.low %v497_v56, %v501_v57 }
 0x25e   :  { %2081 = vmatpush1.bf16.msra.mxu0 %v4375_v61  ;;  %v4440_v61 = vcombine.high %v497_v56, %v501_v57  ;;  %v510_v2 = vld [vmem:[#allocation7 + $0x6b8] sm:$0xff]  ;;  %v4441_v4 = vcombine.low %v498_v58, %v502_v59 }
 0x25f   :  { %2163 = vmatpush1.bf16.msra.mxu1 %v4377_v62  ;;  %2082 = vmatprep.subr.bf16.mxu0 %v4384_v63  ;;  %v4442_v62 = vcombine.high %v498_v58, %v502_v59  ;;  %v505_v63 = vld [vmem:[#allocation7 + $0x690] sm:$0xff]  ;;  %v4449_v12 = vcombine.low %v506_v1, %v510_v2  ;;  %v546_v47 = vld [vmem:[#allocation7 + $0x7d8] sm:$0xff] }
 0x260   :  { %2164 = vmatprep.subr.bf16.mxu1 %v4386_v0  ;;  %v509_v0 = vld [vmem:[#allocation7 + $0x6b0] sm:$0xff]  ;;  %v550_v48 = vld [vmem:[#allocation7 + $0x7f8] sm:$0xff] }
 0x261   :  { %v4447_v11 = vcombine.low %v505_v63, %v509_v0 }
 0x262   :  { %2083 = vmatpush1.bf16.msra.mxu0 %v4383_v5  ;;  %v4448_v5 = vcombine.high %v505_v63, %v509_v0  ;;  %v4809_v63 = vld [vmem:[#allocation8] ss:$16 sps:$4 sm:$0xff]   ;;  %v4811_v0 = vld [vmem:[#allocation8 + $0x4] ss:$16 sps:$4 sm:$0xff]  }
 0x263   :  { %2165 = vmatpush1.bf16.msra.mxu1 %v4385_v15  ;;  %2084 = vmatprep.subr.bf16.mxu0 %v4392_v6  ;;  %v4450_v15 = vcombine.high %v506_v1, %v510_v2  ;;  %v513_v6 = vld [vmem:[#allocation7 + $0x6d0] sm:$0xff]  ;;  %v4812_v1 = vld [vmem:[#allocation8 + $0x8] ss:$16 sps:$4 sm:$0xff]   ;;  %v4814_v2 = vld [vmem:[#allocation8 + $0xc] ss:$16 sps:$4 sm:$0xff]  }
 0x264   :  { %2166 = vmatprep.subr.bf16.mxu1 %v4394_v7  ;;  %v517_v7 = vld [vmem:[#allocation7 + $0x6f0] sm:$0xff] }
 0x265   :  { %v4455_v16 = vcombine.low %v513_v6, %v517_v7 }
 0x266   :  { %2085 = vmatpush1.bf16.msra.mxu0 %v4391_v18  ;;  %v4456_v18 = vcombine.high %v513_v6, %v517_v7  ;;  %v4826_v6 = vld [vmem:[#allocation8 + $0x4c] ss:$16 sps:$4 sm:$0xff]   ;;  %v4821_v7 = vld [vmem:[#allocation8 + $0x40] ss:$16 sps:$4 sm:$0xff]  }
 0x267   :  { %2167 = vmatpush1.bf16.msra.mxu1 %v4393_v13  ;;  %2086 = vmatprep.subr.bf16.mxu0 %v4400_v42  ;;  %v4458_v13 = vcombine.high %v514_v8, %v518_v10  ;;  %v521_v42 = vld [vmem:[#allocation7 + $0x710] sm:$0xff]  ;;  %v4824_v8 = vld [vmem:[#allocation8 + $0x48] ss:$16 sps:$4 sm:$0xff]  }
 0x268   :  { %2168 = vmatprep.subr.bf16.mxu1 %v4402_v41  ;;  %v525_v41 = vld [vmem:[#allocation7 + $0x730] sm:$0xff] }
 0x269   :  { %v4463_v30 = vcombine.low %v521_v42, %v525_v41  ;;  %v4829_v10 = vld [vmem:[#allocation8 + $0x64] ss:$16 sps:$4 sm:$0xff]  }
 0x26a   :  { %2087 = vmatpush1.bf16.msra.mxu0 %v4399_v19  ;;  %v4464_v19 = vcombine.high %v521_v42, %v525_v41  ;;  %v4838_v42 = vld [vmem:[#allocation8 + $0x8c] ss:$16 sps:$4 sm:$0xff]   ;;  %v4833_v41 = vld [vmem:[#allocation8 + $0x80] ss:$16 sps:$4 sm:$0xff]  }
 0x26b   :  { %2169 = vmatpush1.bf16.msra.mxu1 %v4401_v20  ;;  %2088 = vmatprep.subr.bf16.mxu0 %v4408_v21  ;;  %v4466_v20 = vcombine.high %v522_v43, %v526_v49  ;;  %v529_v21 = vld [vmem:[#allocation7 + $0x750] sm:$0xff]  ;;  %v4836_v43 = vld [vmem:[#allocation8 + $0x88] ss:$16 sps:$4 sm:$0xff]  }
 0x26c   :  { %2170 = vmatprep.subr.bf16.mxu1 %v4410_v22  ;;  %v533_v22 = vld [vmem:[#allocation7 + $0x770] sm:$0xff] }
 0x26d   :  { %v4471_v39 = vcombine.low %v529_v21, %v533_v22  ;;  %v4841_v49 = vld [vmem:[#allocation8 + $0xa4] ss:$16 sps:$4 sm:$0xff]  }
 0x26e   :  { %2089 = vmatpush1.bf16.msra.mxu0 %v4407_v32  ;;  %v4472_v32 = vcombine.high %v529_v21, %v533_v22  ;;  %v4850_v21 = vld [vmem:[#allocation8 + $0xcc] ss:$16 sps:$4 sm:$0xff]   ;;  %v4845_v22 = vld [vmem:[#allocation8 + $0xc0] ss:$16 sps:$4 sm:$0xff]  }
 0x26f   :  { %2171 = vmatpush1.bf16.msra.mxu1 %v4409_v33  ;;  %2090 = vmatprep.subr.bf16.mxu0 %v4416_v34  ;;  %v4474_v33 = vcombine.high %v530_v23, %v534_v26  ;;  %v537_v34 = vld [vmem:[#allocation7 + $0x790] sm:$0xff]  ;;  %v4848_v23 = vld [vmem:[#allocation8 + $0xc8] ss:$16 sps:$4 sm:$0xff]  }
 0x270   :  { %2172 = vmatprep.subr.bf16.mxu1 %v4418_v36  ;;  %v541_v36 = vld [vmem:[#allocation7 + $0x7b0] sm:$0xff] }
 0x271   :  { %v4479_v50 = vcombine.low %v537_v34, %v541_v36  ;;  %v4853_v26 = vld [vmem:[#allocation8 + $0xe4] ss:$16 sps:$4 sm:$0xff]  }
 0x272   :  { %2091 = vmatpush1.bf16.msra.mxu0 %v4415_v44  ;;  %v4480_v44 = vcombine.high %v537_v34, %v541_v36  ;;  %v4862_v34 = vld [vmem:[#allocation8 + $0x10c] ss:$16 sps:$4 sm:$0xff]   ;;  %v4857_v36 = vld [vmem:[#allocation8 + $0x100] ss:$16 sps:$4 sm:$0xff]  }
 0x273   :  { %2173 = vmatpush1.bf16.msra.mxu1 %v4417_v45  ;;  %2092 = vmatprep.subr.bf16.mxu0 %v4424_v46  ;;  %v4482_v45 = vcombine.high %v538_v37, %v542_v38  ;;  %v545_v46 = vld [vmem:[#allocation7 + $0x7d0] sm:$0xff]  ;;  %v4860_v37 = vld [vmem:[#allocation8 + $0x108] ss:$16 sps:$4 sm:$0xff]  }
 0x274   :  { %2174 = vmatprep.subr.bf16.mxu1 %v4426_v9  ;;  %v549_v9 = vld [vmem:[#allocation7 + $0x7f0] sm:$0xff] }
 0x275   :  { %v4865_v38 = vld [vmem:[#allocation8 + $0x124] ss:$16 sps:$4 sm:$0xff]  }
 0x276   :  { %2093 = vmatpush1.bf16.msra.mxu0 %v4423_v52  ;;  %v4488_v52 = vcombine.high %v545_v46, %v549_v9 }
 0x277   :  { %2175 = vmatpush1.bf16.msra.mxu1 %v4425_v53  ;;  %2094 = vmatprep.subr.bf16.mxu0 %v4432_v54  ;;  %v4490_v53 = vcombine.high %v546_v47, %v550_v48  ;;  %v4487_v54 = vcombine.low %v545_v46, %v549_v9 }
 0x278   :  { %2176 = vmatprep.subr.bf16.mxu1 %v4434_v55  ;;  %v4489_v55 = vcombine.low %v546_v47, %v550_v48 }
 0x27a   :  { %2095 = vmatpush1.bf16.msra.mxu0 %v4431_v14 }
 0x27b   :  { %2177 = vmatpush1.bf16.msra.mxu1 %v4433_v60  ;;  %2096 = vmatprep.subr.bf16.mxu0 %v4440_v61 }
 0x27c   :  { %2178 = vmatprep.subr.bf16.mxu1 %v4442_v62 }
 0x27e   :  { %2097 = vmatpush1.bf16.msra.mxu0 %v4439_v3  ;;  %v4817_v3 = vld [vmem:[#allocation8 + $0x24] ss:$16 sps:$4 sm:$0xff]  }
 0x27f   :  { %2179 = vmatpush1.bf16.msra.mxu1 %v4441_v4  ;;  %2098 = vmatprep.subr.bf16.mxu0 %v4448_v5  ;;  %v4820_v4 = vld [vmem:[#allocation8 + $0x2c] ss:$16 sps:$4 sm:$0xff]   ;;  %v4818_v5 = vld [vmem:[#allocation8 + $0x28] ss:$16 sps:$4 sm:$0xff]  }
 0x280   :  { %2180 = vmatprep.subr.bf16.mxu1 %v4450_v15  ;;  %v4823_v15 = vld [vmem:[#allocation8 + $0x44] ss:$16 sps:$4 sm:$0xff]  }
 0x282   :  { %2099 = vmatpush1.bf16.msra.mxu0 %v4447_v11  ;;  %v4832_v11 = vld [vmem:[#allocation8 + $0x6c] ss:$16 sps:$4 sm:$0xff]  }
 0x283   :  { %2181 = vmatpush1.bf16.msra.mxu1 %v4449_v12  ;;  %2100 = vmatprep.subr.bf16.mxu0 %v4456_v18  ;;  %v4827_v12 = vld [vmem:[#allocation8 + $0x60] ss:$16 sps:$4 sm:$0xff]   ;;  %v4830_v18 = vld [vmem:[#allocation8 + $0x68] ss:$16 sps:$4 sm:$0xff]  }
 0x284   :  { %2182 = vmatprep.subr.bf16.mxu1 %v4458_v13  ;;  %v4835_v13 = vld [vmem:[#allocation8 + $0x84] ss:$16 sps:$4 sm:$0xff]  }
 0x286   :  { %2101 = vmatpush1.bf16.msra.mxu0 %v4455_v16  ;;  %v4844_v16 = vld [vmem:[#allocation8 + $0xac] ss:$16 sps:$4 sm:$0xff]  }
 0x287   :  { %2183 = vmatpush1.bf16.msra.mxu1 %v4457_v17  ;;  %2102 = vmatprep.subr.bf16.mxu0 %v4464_v19  ;;  %v4839_v17 = vld [vmem:[#allocation8 + $0xa0] ss:$16 sps:$4 sm:$0xff]   ;;  %v4842_v19 = vld [vmem:[#allocation8 + $0xa8] ss:$16 sps:$4 sm:$0xff]  }
 0x288   :  { %2184 = vmatprep.subr.bf16.mxu1 %v4466_v20  ;;  %v4847_v20 = vld [vmem:[#allocation8 + $0xc4] ss:$16 sps:$4 sm:$0xff]  }
 0x28a   :  { %2103 = vmatpush1.bf16.msra.mxu0 %v4463_v30  ;;  %v4856_v30 = vld [vmem:[#allocation8 + $0xec] ss:$16 sps:$4 sm:$0xff]  }
 0x28b   :  { %2185 = vmatpush1.bf16.msra.mxu1 %v4465_v31  ;;  %2104 = vmatprep.subr.bf16.mxu0 %v4472_v32  ;;  %v4851_v31 = vld [vmem:[#allocation8 + $0xe0] ss:$16 sps:$4 sm:$0xff]   ;;  %v4854_v32 = vld [vmem:[#allocation8 + $0xe8] ss:$16 sps:$4 sm:$0xff]  }
 0x28c   :  { %2186 = vmatprep.subr.bf16.mxu1 %v4474_v33  ;;  %v4859_v33 = vld [vmem:[#allocation8 + $0x104] ss:$16 sps:$4 sm:$0xff]  }
 0x28e   :  { %2105 = vmatpush1.bf16.msra.mxu0 %v4471_v39  ;;  %v4868_v39 = vld [vmem:[#allocation8 + $0x12c] ss:$16 sps:$4 sm:$0xff]  }
 0x28f   :  { %2187 = vmatpush1.bf16.msra.mxu1 %v4473_v40  ;;  %2106 = vmatprep.subr.bf16.mxu0 %v4480_v44  ;;  %v4863_v40 = vld [vmem:[#allocation8 + $0x120] ss:$16 sps:$4 sm:$0xff]   ;;  %v4866_v44 = vld [vmem:[#allocation8 + $0x128] ss:$16 sps:$4 sm:$0xff]  }
 0x290   :  { %2188 = vmatprep.subr.bf16.mxu1 %v4482_v45  ;;  %v551_v45 = vld [vmem:[%s5588_s4] sm:$0xff] }
 0x291   :  { %v556_v46 = vrot.slane %v551_v45, %v5406_v25  ;;  %v560_v9 = vrot.slane %v551_v45, %v5412_v27 }
 0x292   :  { %2107 = vmatpush1.bf16.msra.mxu0 %v4479_v50  ;;  %v564_v50 = vrot.slane %v551_v45, %v5415_v28 }
 0x293   :  { %2189 = vmatpush1.bf16.msra.mxu1 %v4481_v51  ;;  %2108 = vmatprep.subr.bf16.mxu0 %v4488_v52 }
 0x294   :  { %2190 = vmatprep.subr.bf16.mxu1 %v4490_v53 }
 0x296   :  { %2109 = vmatpush1.bf16.msra.mxu0 %v4487_v54  ;;  %v568_v54 = vrot.slane %v551_v45, %v5418_v29 }
 0x297   :  { %2191 = vmatpush1.bf16.msra.mxu1 %v4489_v55  ;;  %3824 = vmatprep.subr.bf16.mxu0 %v4811_v0 }
 0x298   :  { %3988 = vmatprep.subr.bf16.mxu1 %v4814_v2 }
 0x299   :  { %2111 = vmatmul.mubr.bf16.vlgmr.msra.gmra.mrb[8].mxu0 %v5464_v35 }
 0x29a   :  { %2193 = vmatmul.mubr.bf16.vlgmr.msra.gmra.mrb[8].mxu1 %v5464_v35  ;;  %3825 = vmatpush1.bf16.msra.mxu0 %v4809_v63  ;;  %v4815_v35 = vld [vmem:[#allocation8 + $0x20] ss:$16 sps:$4 sm:$0xff]  }
 0x29b   :  { %3989 = vmatpush1.bf16.msra.mxu1 %v4812_v1  ;;  %3826 = vmatprep.subr.bf16.mxu0 %v4817_v3  ;;  %v583_v1 = vsub.s32 7, %v5403_v24 }
 0x29c   :  { %3990 = vmatprep.subr.bf16.mxu1 %v4820_v4 }
 0x29e   :  { %3827 = vmatpush1.bf16.msra.mxu0 %v4815_v35 }
 0x29f   :  { %3991 = vmatpush1.bf16.msra.mxu1 %v4818_v5  ;;  %3828 = vmatprep.subr.bf16.mxu0 %v4823_v15 }
 0x2a0   :  { %3992 = vmatprep.subr.bf16.mxu1 %v4826_v6 }
 0x2a2   :  { %3829 = vmatpush1.bf16.msra.mxu0 %v4821_v7 }
 0x2a3   :  { %3993 = vmatpush1.bf16.msra.mxu1 %v4824_v8  ;;  %3830 = vmatprep.subr.bf16.mxu0 %v4829_v10  ;;  %v584_v10 = vrot.slane %v551_v45, %v583_v1  ;;  %v4893_v1 = vld [vmem:[#allocation8 + $0x1c0] ss:$16 sps:$4 sm:$0xff]  }
 0x2a4   :  { %3994 = vmatprep.subr.bf16.mxu1 %v4832_v11 }
 0x2a6   :  { %3831 = vmatpush1.bf16.msra.mxu0 %v4827_v12 }
 0x2a7   :  { %3995 = vmatpush1.bf16.msra.mxu1 %v4830_v18  ;;  %3832 = vmatprep.subr.bf16.mxu0 %v4835_v13 }
 0x2a8   :  { %3996 = vmatprep.subr.bf16.mxu1 %v4838_v42 }
 0x2aa   :  { %3833 = vmatpush1.bf16.msra.mxu0 %v4833_v41 }
 0x2ab   :  { %3997 = vmatpush1.bf16.msra.mxu1 %v4836_v43  ;;  %3834 = vmatprep.subr.bf16.mxu0 %v4841_v49 }
 0x2ac   :  { %3998 = vmatprep.subr.bf16.mxu1 %v4844_v16 }
 0x2ae   :  { %3835 = vmatpush1.bf16.msra.mxu0 %v4839_v17 }
 0x2af   :  { %3999 = vmatpush1.bf16.msra.mxu1 %v4842_v19  ;;  %3836 = vmatprep.subr.bf16.mxu0 %v4847_v20 }
 0x2b0   :  { %4000 = vmatprep.subr.bf16.mxu1 %v4850_v21 }
 0x2b2   :  { %3837 = vmatpush1.bf16.msra.mxu0 %v4845_v22 }
 0x2b3   :  { %4001 = vmatpush1.bf16.msra.mxu1 %v4848_v23  ;;  %3838 = vmatprep.subr.bf16.mxu0 %v4853_v26 }
 0x2b4   :  { %4002 = vmatprep.subr.bf16.mxu1 %v4856_v30 }
 0x2b6   :  { %3839 = vmatpush1.bf16.msra.mxu0 %v4851_v31 }
 0x2b7   :  { %4003 = vmatpush1.bf16.msra.mxu1 %v4854_v32  ;;  %3840 = vmatprep.subr.bf16.mxu0 %v4859_v33 }
 0x2b8   :  { %4004 = vmatprep.subr.bf16.mxu1 %v4862_v34 }
 0x2ba   :  { %3841 = vmatpush1.bf16.msra.mxu0 %v4857_v36 }
 0x2bb   :  { %4005 = vmatpush1.bf16.msra.mxu1 %v4860_v37  ;;  %3842 = vmatprep.subr.bf16.mxu0 %v4865_v38 }
 0x2bc   :  { %4006 = vmatprep.subr.bf16.mxu1 %v4868_v39 }
 0x2be   :  { %3843 = vmatpush1.bf16.msra.mxu0 %v4863_v40 }
 0x2bf   :  { %4007 = vmatpush1.bf16.msra.mxu1 %v4866_v44  ;;  %v4869_v44 = vld [vmem:[#allocation8 + $0x140] ss:$16 sps:$4 sm:$0xff]  }
 0x2ec   :  { %v5476_v56 = vpop.f32.mrb[4].mxu0  ;;  %v5478_v57 = vpop.f32.mrb[4].mxu1 }
 0x2ed   :  { %v5480_v58 = vpop.f32.mrb[5].mxu0  ;;  %v5482_v59 = vpop.f32.mrb[5].mxu1  ;;  %v4748_v47 = vadd.f32 %v5476_v56, %v556_v46  ;;  %v4750_v53 = vadd.f32 %v5478_v57, %v564_v50  ;;  %v571_v56 = vsub.s32 4, %v5403_v24  ;;  %v4872_v46 = vld [vmem:[#allocation8 + $0x148] ss:$16 sps:$4 sm:$0xff]  }
 0x2ee   :  { %v1952_v14 = vpop.f32.mrb[6].mxu0  ;;  %v2034_v60 = vpop.f32.mrb[6].mxu1  ;;  %v4749_v48 = vadd.f32 %v5480_v58, %v560_v9  ;;  %v4751_v58 = vadd.f32 %v5482_v59, %v568_v54  ;;  %v4874_v9 = vld [vmem:[#allocation8 + $0x14c] ss:$16 sps:$4 sm:$0xff]   ;;  %v4875_v50 = vld [vmem:[#allocation8 + $0x160] ss:$16 sps:$4 sm:$0xff]  }
 0x2ef   :  { %v1953_v61 = vpop.f32.mrb[7].mxu0  ;;  %v2035_v62 = vpop.f32.mrb[7].mxu1  ;;  %v5492_v51 = vmax.f32 %v4748_v47, 0.0  ;;  %v5503_v60 = vmax.f32 %v4750_v53, 0.0  ;;  %v572_v0 = vrot.slane %v551_v45, %v571_v56  ;;  %4008 = vmatprep.subr.bf16.mxu1 %v4874_v9  ;;  %v4877_v47 = vld [vmem:[#allocation8 + $0x164] ss:$16 sps:$4 sm:$0xff]  }
 0x2f0   :  { %v5494_v52 = vmax.f32 %v4749_v48, 0.0  ;;  %v579_v61 = vsub.s32 6, %v5403_v24  ;;  %v575_v62 = vsub.s32 5, %v5403_v24  ;;  %v5513_v3 = vmax.f32 %v4751_v58, 0.0  ;;  %4009 = vmatpush1.bf16.msra.mxu1 %v4872_v46  ;;  %v4880_v48 = vld [vmem:[#allocation8 + $0x16c] ss:$16 sps:$4 sm:$0xff]  }
 0x2f1   :  { %v2219_v55 = vmul.f32 %v5492_v51, %v5492_v51  ;;  %v2221_v2 = vmul.f32 %v5503_v60, %v5503_v60  ;;  %v4878_v53 = vld [vmem:[#allocation8 + $0x168] ss:$16 sps:$4 sm:$0xff]   ;;  %4010 = vmatprep.subr.bf16.mxu1 %v4880_v48  ;;  %v4883_v54 = vld [vmem:[#allocation8 + $0x184] ss:$16 sps:$4 sm:$0xff]   ;;  %v4917_v46 = vld [vmem:[#allocation8 + $0x240] ss:$16 sps:$4 sm:$0xff]  }
 0x2f2   :  { %v2220_v14 = vmul.f32 %v5494_v52, %v5494_v52  ;;  %v2209_v57 = vadd.f32 %v5494_v52, %v5492_v51  ;;  %v580_v4 = vrot.slane %v551_v45, %v579_v61  ;;  %v576_v35 = vrot.slane %v551_v45, %v575_v62  ;;  %v4871_v45 = vld [vmem:[#allocation8 + $0x144] ss:$16 sps:$4 sm:$0xff]   ;;  %v4884_v56 = vld [vmem:[#allocation8 + $0x188] ss:$16 sps:$4 sm:$0xff]   ;;  %v4892_v61 = vld [vmem:[#allocation8 + $0x1ac] ss:$16 sps:$4 sm:$0xff]  }
 0x2f3   :  { %v2222_v11 = vmul.f32 %v5513_v3, %v5513_v3  ;;  %3844 = vmatprep.subr.bf16.mxu0 %v4871_v45  ;;  %v4889_v58 = vld [vmem:[#allocation8 + $0x1a4] ss:$16 sps:$4 sm:$0xff]   ;;  %v4887_v62 = vld [vmem:[#allocation8 + $0x1a0] ss:$16 sps:$4 sm:$0xff]   ;;  %v4922_v45 = vld [vmem:[#allocation8 + $0x24c] ss:$16 sps:$4 sm:$0xff]  }
 0x2f4   :  { %v2227_v63 = vadd.f32 %v2220_v14, %v2219_v55  ;;  %v2210_v59 = vadd.f32 %v2209_v57, %v5503_v60  ;;  %3845 = vmatpush1.bf16.msra.mxu0 %v4869_v44  ;;  %4011 = vmatpush1.bf16.msra.mxu1 %v4878_v53  ;;  %v4886_v55 = vld [vmem:[#allocation8 + $0x18c] ss:$16 sps:$4 sm:$0xff]   ;;  %v4881_v14 = vld [vmem:[#allocation8 + $0x180] ss:$16 sps:$4 sm:$0xff]   ;;  %v4890_v57 = vld [vmem:[#allocation8 + $0x1a8] ss:$16 sps:$4 sm:$0xff]  }
 0x2f5   :  { %3846 = vmatprep.subr.bf16.mxu0 %v4877_v47  ;;  %4012 = vmatprep.subr.bf16.mxu1 %v4886_v55  ;;  %v4919_v44 = vld [vmem:[#allocation8 + $0x244] ss:$16 sps:$4 sm:$0xff]   ;;  %v4920_v9 = vld [vmem:[#allocation8 + $0x248] ss:$16 sps:$4 sm:$0xff]   ;;  %v4928_v48 = vld [vmem:[#allocation8 + $0x26c] ss:$16 sps:$4 sm:$0xff]  }
 0x2f6   :  { %v2228_v5 = vadd.f32 %v2227_v63, %v2221_v2  ;;  %v2211_v42 = vadd.f32 %v2210_v59, %v5513_v3  ;;  %v4895_v63 = vld [vmem:[#allocation8 + $0x1c4] ss:$16 sps:$4 sm:$0xff]   ;;  %v4896_v2 = vld [vmem:[#allocation8 + $0x1c8] ss:$16 sps:$4 sm:$0xff]   ;;  %v4899_v59 = vld [vmem:[#allocation8 + $0x1e0] ss:$16 sps:$4 sm:$0xff]  }
 0x2f7   :  { %v4925_v47 = vld [vmem:[#allocation8 + $0x264] ss:$16 sps:$4 sm:$0xff]   ;;  %v4926_v53 = vld [vmem:[#allocation8 + $0x268] ss:$16 sps:$4 sm:$0xff]   ;;  %v4934_v55 = vld [vmem:[#allocation8 + $0x28c] ss:$16 sps:$4 sm:$0xff]  }
 0x2f8   :  { %v2229_v16 = vadd.f32 %v2228_v5, %v2222_v11  ;;  %3847 = vmatpush1.bf16.msra.mxu0 %v4875_v50  ;;  %4013 = vmatpush1.bf16.msra.mxu1 %v4884_v56  ;;  %v4902_v5 = vld [vmem:[#allocation8 + $0x1e8] ss:$16 sps:$4 sm:$0xff]   ;;  %v4923_v50 = vld [vmem:[#allocation8 + $0x260] ss:$16 sps:$4 sm:$0xff]  }
 0x2f9   :  { %3848 = vmatprep.subr.bf16.mxu0 %v4883_v54  ;;  %4014 = vmatprep.subr.bf16.mxu1 %v4892_v61  ;;  %v4931_v54 = vld [vmem:[#allocation8 + $0x284] ss:$16 sps:$4 sm:$0xff]   ;;  %v4932_v56 = vld [vmem:[#allocation8 + $0x288] ss:$16 sps:$4 sm:$0xff]   ;;  %v4940_v61 = vld [vmem:[#allocation8 + $0x2ac] ss:$16 sps:$4 sm:$0xff]  }
 0x2fc   :  { %3849 = vmatpush1.bf16.msra.mxu0 %v4881_v14  ;;  %4015 = vmatpush1.bf16.msra.mxu1 %v4890_v57  ;;  %v4929_v14 = vld [vmem:[#allocation8 + $0x280] ss:$16 sps:$4 sm:$0xff]   ;;  %v4938_v57 = vld [vmem:[#allocation8 + $0x2a8] ss:$16 sps:$4 sm:$0xff]  }
 0x2fd   :  { %3850 = vmatprep.subr.bf16.mxu0 %v4889_v58  ;;  %v4937_v58 = vld [vmem:[#allocation8 + $0x2a4] ss:$16 sps:$4 sm:$0xff]  }
 0x300   :  { %3851 = vmatpush1.bf16.msra.mxu0 %v4887_v62  ;;  %v4935_v62 = vld [vmem:[#allocation8 + $0x2a0] ss:$16 sps:$4 sm:$0xff]  }
 0x301   :  { %3852 = vmatprep.subr.bf16.mxu0 %v4895_v63  ;;  %v4943_v63 = vld [vmem:[#allocation8 + $0x2c4] ss:$16 sps:$4 sm:$0xff]  }
 0x304   :  { %3853 = vmatpush1.bf16.msra.mxu0 %v4893_v1  ;;  %v4941_v1 = vld [vmem:[#allocation8 + $0x2c0] ss:$16 sps:$4 sm:$0xff]  }
 0x36c   :  { %v2112_v15 = vpop.f32.mrb[8].mxu0 }
 0x36d   :  { %v4752_v6 = vadd.f32 %v2112_v15, %v572_v0  ;;  %v2194_v7 = vpop.f32.mrb[8].mxu1  ;;  %v2114_v8 = vpop.f32.mrb[9].mxu0  ;;  %v4898_v0 = vld [vmem:[#allocation8 + $0x1cc] ss:$16 sps:$4 sm:$0xff]   ;;  %v4907_v15 = vld [vmem:[#allocation8 + $0x204] ss:$16 sps:$4 sm:$0xff]  }
 0x36e   :  { %v4754_v12 = vadd.f32 %v2194_v7, %v580_v4  ;;  %v4753_v24 = vadd.f32 %v2114_v8, %v576_v35  ;;  %v2196_v18 = vpop.f32.mrb[9].mxu1  ;;  %v2116_v13 = vpop.f32.mrb[10].mxu0  ;;  %4016 = vmatprep.subr.bf16.mxu1 %v4898_v0  ;;  %v4901_v4 = vld [vmem:[#allocation8 + $0x1e4] ss:$16 sps:$4 sm:$0xff]   ;;  %v4904_v35 = vld [vmem:[#allocation8 + $0x1ec] ss:$16 sps:$4 sm:$0xff]  }
 0x36f   :  { %v5519_v41 = vmax.f32 %v4752_v6, 0.0  ;;  %v2198_v43 = vpop.f32.mrb[10].mxu1  ;;  %v2117_v49 = vpop.f32.mrb[11].mxu0  ;;  %v4755_v23 = vadd.f32 %v2196_v18, %v584_v10  ;;  %4017 = vmatpush1.bf16.msra.mxu1 %v4896_v2  ;;  %3854 = vmatprep.subr.bf16.mxu0 %v4901_v4  ;;  %v4910_v6 = vld [vmem:[#allocation8 + $0x20c] ss:$16 sps:$4 sm:$0xff]  }
 0x370   :  { %v5521_v17 = vmax.f32 %v4753_v24, 0.0  ;;  %v2199_v19 = vpop.f32.mrb[11].mxu1  ;;  %v5526_v22 = vmax.f32 %v4754_v12, 0.0  ;;  %4018 = vmatprep.subr.bf16.mxu1 %v4904_v35  ;;  %3855 = vmatpush1.bf16.msra.mxu0 %v4899_v59  ;;  %v4946_v0 = vld [vmem:[#allocation8 + $0x2cc] ss:$16 sps:$4 sm:$0xff]  }
 0x371   :  { %v2212_v20 = vadd.f32 %v2211_v42, %v5519_v41  ;;  %v2223_v21 = vmul.f32 %v5519_v41, %v5519_v41  ;;  %v5531_v32 = vmax.f32 %v4755_v23, 0.0  ;;  %3865 = vmatprep.subr.bf16.mxu0 %v4907_v15  ;;  %v4944_v2 = vld [vmem:[#allocation8 + $0x2c8] ss:$16 sps:$4 sm:$0xff]   ;;  %v4949_v4 = vld [vmem:[#allocation8 + $0x2e4] ss:$16 sps:$4 sm:$0xff]  }
 0x372   :  { %v2224_v26 = vmul.f32 %v5521_v17, %v5521_v17  ;;  %v2225_v34 = vmul.f32 %v5526_v22, %v5526_v22  ;;  %v4952_v35 = vld [vmem:[#allocation8 + $0x2ec] ss:$16 sps:$4 sm:$0xff]   ;;  %v4947_v59 = vld [vmem:[#allocation8 + $0x2e0] ss:$16 sps:$4 sm:$0xff]   ;;  %v4955_v15 = vld [vmem:[#allocation8 + $0x304] ss:$16 sps:$4 sm:$0xff]  }
 0x373   :  { %v2213_v30 = vadd.f32 %v2212_v20, %v5521_v17  ;;  %v2230_v31 = vadd.f32 %v2229_v16, %v2223_v21  ;;  %v2226_v39 = vmul.f32 %v5531_v32, %v5531_v32  ;;  %4019 = vmatpush1.bf16.msra.mxu1 %v4902_v5  ;;  %v4950_v5 = vld [vmem:[#allocation8 + $0x2e8] ss:$16 sps:$4 sm:$0xff]  }
 0x374   :  { %4029 = vmatprep.subr.bf16.mxu1 %v4910_v6  ;;  %v4958_v6 = vld [vmem:[#allocation8 + $0x30c] ss:$16 sps:$4 sm:$0xff]  }
 0x375   :  { %v2214_v33 = vadd.f32 %v2213_v30, %v5526_v22  ;;  %v2231_v36 = vadd.f32 %v2230_v31, %v2224_v26 }
 0x377   :  { %v2215_v37 = vadd.f32 %v2214_v33, %v5531_v32  ;;  %v2232_v38 = vadd.f32 %v2231_v36, %v2225_v34  ;;  %v4905_v36 = vld [vmem:[#allocation8 + $0x200] ss:$16 sps:$4 sm:$0xff]  }
 0x379   :  { %2216 = vadd.xlane.f32.xlu1 %v2215_v37  ;;  %v2233_v40 = vadd.f32 %v2232_v38, %v2226_v39  ;;  %v4911_v39 = vld [vmem:[#allocation8 + $0x220] ss:$16 sps:$4 sm:$0xff]  }
 0x37d   :  { %2234 = vadd.xlane.f32.xlu1 %v2233_v40  ;;  %v4914_v40 = vld [vmem:[#allocation8 + $0x228] ss:$16 sps:$4 sm:$0xff]  }
 0x406   :  { %v2217_v7 = vpop.xlane.xlu1 %2216 }
 0x407   :  { %v2218_v8 = vmul.f32 0.0009765625, %v2217_v7  ;;  %v4953_v7 = vld [vmem:[#allocation8 + $0x300] ss:$16 sps:$4 sm:$0xff]  }
 0x409   :  { %v2237_v11 = vmul.f32 %v2218_v8, %v2218_v8  ;;  %v2241_v42 = vsub.f32 %v5494_v52, %v2218_v8  ;;  %v2240_v43 = vsub.f32 %v5492_v51, %v2218_v8  ;;  %v2243_v49 = vsub.f32 %v5513_v3, %v2218_v8 }
 0x40a   :  { %v2235_v10 = vpop.xlane.xlu1 %2234  ;;  %v2242_v16 = vsub.f32 %v5503_v60, %v2218_v8  ;;  %v2245_v20 = vsub.f32 %v5521_v17, %v2218_v8  ;;  %v2244_v21 = vsub.f32 %v5519_v41, %v2218_v8  ;;  %v2247_v23 = vsub.f32 %v5531_v32, %v2218_v8  ;;  %v4908_v41 = vld [vmem:[#allocation8 + $0x208] ss:$16 sps:$4 sm:$0xff]   ;;  %v4916_v32 = vld [vmem:[#allocation8 + $0x22c] ss:$16 sps:$4 sm:$0xff]  }
 0x40b   :  { %v2236_v12 = vmul.f32 0.0009765625, %v2235_v10  ;;  %v2246_v26 = vsub.f32 %v5526_v22, %v2218_v8  ;;  %v4913_v22 = vld [vmem:[#allocation8 + $0x224] ss:$16 sps:$4 sm:$0xff]   ;;  %v4956_v8 = vld [vmem:[#allocation8 + $0x308] ss:$16 sps:$4 sm:$0xff]  }
 0x40c   :  { %v4961_v10 = vld [vmem:[#allocation8 + $0x324] ss:$16 sps:$4 sm:$0xff]  }
 0x40d   :  { %v2238_v24 = vsub.f32 %v2236_v12, %v2237_v11  ;;  %v4964_v11 = vld [vmem:[#allocation8 + $0x32c] ss:$16 sps:$4 sm:$0xff]   ;;  %v4959_v12 = vld [vmem:[#allocation8 + $0x320] ss:$16 sps:$4 sm:$0xff]  }
 0x40f   :  { %v2239_v18 = vmax.f32 %v2238_v24, 0.0  ;;  %v4962_v24 = vld [vmem:[#allocation8 + $0x328] ss:$16 sps:$4 sm:$0xff]  }
 0x411   :  { %v2248_v13 = vadd.f32 1e-05, %v2239_v18  ;;  %v4967_v18 = vld [vmem:[#allocation8 + $0x344] ss:$16 sps:$4 sm:$0xff]  }
 0x413   :  { %5195 = vrsqrt.f32 %v2248_v13  ;;  %v4970_v13 = vld [vmem:[#allocation8 + $0x34c] ss:$16 sps:$4 sm:$0xff]  }
 0x41d   :  { %v5196_v19 = vpop.eup %5195 }
 0x41e   :  { %v2251_v30 = vmul.f32 %v5196_v19, %v2241_v42  ;;  %v2250_v31 = vmul.f32 %v5196_v19, %v2240_v43  ;;  %v2253_v33 = vmul.f32 %v5196_v19, %v2243_v49  ;;  %v5547_v34 = vmul.f32 %v5196_v19, %v2242_v16  ;;  %v4965_v42 = vld [vmem:[#allocation8 + $0x340] ss:$16 sps:$4 sm:$0xff]   ;;  %v4968_v43 = vld [vmem:[#allocation8 + $0x348] ss:$16 sps:$4 sm:$0xff]   ;;  %v4973_v49 = vld [vmem:[#allocation8 + $0x364] ss:$16 sps:$4 sm:$0xff]  }
 0x41f   :  { %v5549_v52 = vmul.f32 %v5196_v19, %v2245_v20  ;;  %v5551_v51 = vmul.f32 %v5196_v19, %v2244_v21  ;;  %v5553_v3 = vmul.f32 %v5196_v19, %v2247_v23  ;;  %v5555_v60 = vmul.f32 %v5196_v19, %v2246_v26  ;;  %v4976_v16 = vld [vmem:[#allocation8 + $0x36c] ss:$16 sps:$4 sm:$0xff]   ;;  %v4971_v19 = vld [vmem:[#allocation8 + $0x360] ss:$16 sps:$4 sm:$0xff]   ;;  %v4974_v20 = vld [vmem:[#allocation8 + $0x368] ss:$16 sps:$4 sm:$0xff]  }
 0x420   :  { %v2259_v17 = vpack.c.bf16 %v2251_v30, %v2251_v30  ;;  %v2258_v37 = vpack.c.bf16 %v2250_v31, %v2250_v31  ;;  %v2261_v38 = vpack.c.bf16 %v2253_v33, %v2253_v33  ;;  %v4979_v21 = vld [vmem:[#allocation8 + $0x384] ss:$16 sps:$4 sm:$0xff]   ;;  %v4982_v23 = vld [vmem:[#allocation8 + $0x38c] ss:$16 sps:$4 sm:$0xff]   ;;  %v4977_v26 = vld [vmem:[#allocation8 + $0x380] ss:$16 sps:$4 sm:$0xff]  }
 0x421   :  { %v4980_v30 = vld [vmem:[#allocation8 + $0x388] ss:$16 sps:$4 sm:$0xff]   ;;  %v4985_v31 = vld [vmem:[#allocation8 + $0x3a4] ss:$16 sps:$4 sm:$0xff]   ;;  %v4988_v33 = vld [vmem:[#allocation8 + $0x3ac] ss:$16 sps:$4 sm:$0xff]  }
 0x422   :  { %3856 = vmatprep.mubr.bf16.mxu0 %v2259_v17  ;;  %4020 = vmatprep.mubr.bf16.mxu1 %v2259_v17  ;;  %v4983_v17 = vld [vmem:[#allocation8 + $0x3a0] ss:$16 sps:$4 sm:$0xff]  }
 0x423   :  { %3857 = vmatmul.mubr.bf16.vlgmr.msra.gmra.mrb[12].mxu0 %v2258_v37  ;;  %4021 = vmatmul.mubr.bf16.vlgmr.msra.gmra.mrb[12].mxu1 %v2258_v37  ;;  %v4994_v37 = vld [vmem:[#allocation8 + $0x3cc] ss:$16 sps:$4 sm:$0xff]  }
 0x424   :  { %3866 = vmatpush1.bf16.msra.mxu0 %v4905_v36  ;;  %4030 = vmatpush1.bf16.msra.mxu1 %v4908_v41  ;;  %v4986_v36 = vld [vmem:[#allocation8 + $0x3a8] ss:$16 sps:$4 sm:$0xff]   ;;  %v4991_v41 = vld [vmem:[#allocation8 + $0x3c4] ss:$16 sps:$4 sm:$0xff]  }
 0x425   :  { %3897 = vmatprep.mubr.bf16.mxu0 %v2261_v38  ;;  %4061 = vmatprep.mubr.bf16.mxu1 %v2261_v38  ;;  %v4997_v38 = vld [vmem:[#allocation8 + $0x3e4] ss:$16 sps:$4 sm:$0xff]  }
 0x426   :  { %3867 = vmatprep.subr.bf16.mxu0 %v4913_v22  ;;  %4031 = vmatprep.subr.bf16.mxu1 %v4916_v32  ;;  %v4989_v22 = vld [vmem:[#allocation8 + $0x3c0] ss:$16 sps:$4 sm:$0xff]   ;;  %v4992_v32 = vld [vmem:[#allocation8 + $0x3c8] ss:$16 sps:$4 sm:$0xff]  }
 0x428   :  { %3868 = vmatpush1.bf16.msra.mxu0 %v4911_v39  ;;  %4032 = vmatpush1.bf16.msra.mxu1 %v4914_v40  ;;  %v5000_v39 = vld [vmem:[#allocation8 + $0x3ec] ss:$16 sps:$4 sm:$0xff]   ;;  %v4995_v40 = vld [vmem:[#allocation8 + $0x3e0] ss:$16 sps:$4 sm:$0xff]  }
 0x429   :  { %3869 = vmatprep.subr.bf16.mxu0 %v4919_v44  ;;  %4033 = vmatprep.subr.bf16.mxu1 %v4922_v45  ;;  %v4998_v44 = vld [vmem:[#allocation8 + $0x3e8] ss:$16 sps:$4 sm:$0xff]   ;;  %v5003_v45 = vld [vmem:[#allocation8 + $0x404] ss:$16 sps:$4 sm:$0xff]  }
 0x42c   :  { %3870 = vmatpush1.bf16.msra.mxu0 %v4917_v46  ;;  %4034 = vmatpush1.bf16.msra.mxu1 %v4920_v9  ;;  %v5006_v46 = vld [vmem:[#allocation8 + $0x40c] ss:$16 sps:$4 sm:$0xff]   ;;  %v5001_v9 = vld [vmem:[#allocation8 + $0x400] ss:$16 sps:$4 sm:$0xff]  }
 0x42d   :  { %3871 = vmatprep.subr.bf16.mxu0 %v4925_v47  ;;  %4035 = vmatprep.subr.bf16.mxu1 %v4928_v48  ;;  %v2260_v47 = vpack.c.bf16 %v5547_v34, %v5547_v34  ;;  %v5004_v48 = vld [vmem:[#allocation8 + $0x408] ss:$16 sps:$4 sm:$0xff]   ;;  %v5018_v34 = vld [vmem:[#allocation8 + $0x44c] ss:$16 sps:$4 sm:$0xff]  }
 0x430   :  { %3872 = vmatpush1.bf16.msra.mxu0 %v4923_v50  ;;  %4036 = vmatpush1.bf16.msra.mxu1 %v4926_v53  ;;  %v2263_v50 = vpack.c.bf16 %v5549_v52, %v5549_v52  ;;  %v5009_v53 = vld [vmem:[#allocation8 + $0x424] ss:$16 sps:$4 sm:$0xff]  }
 0x431   :  { %3873 = vmatprep.subr.bf16.mxu0 %v4931_v54  ;;  %4037 = vmatprep.subr.bf16.mxu1 %v4934_v55  ;;  %v5012_v54 = vld [vmem:[#allocation8 + $0x42c] ss:$16 sps:$4 sm:$0xff]   ;;  %v5007_v55 = vld [vmem:[#allocation8 + $0x420] ss:$16 sps:$4 sm:$0xff]   ;;  %v5021_v52 = vld [vmem:[#allocation8 + $0x464] ss:$16 sps:$4 sm:$0xff]  }
 0x434   :  { %3874 = vmatpush1.bf16.msra.mxu0 %v4929_v14  ;;  %4038 = vmatpush1.bf16.msra.mxu1 %v4932_v56  ;;  %v5010_v14 = vld [vmem:[#allocation8 + $0x428] ss:$16 sps:$4 sm:$0xff]   ;;  %v5015_v56 = vld [vmem:[#allocation8 + $0x444] ss:$16 sps:$4 sm:$0xff]  }
 0x435   :  { %3875 = vmatprep.subr.bf16.mxu0 %v4937_v58  ;;  %4039 = vmatprep.subr.bf16.mxu1 %v4940_v61  ;;  %v5013_v58 = vld [vmem:[#allocation8 + $0x440] ss:$16 sps:$4 sm:$0xff]   ;;  %v5016_v61 = vld [vmem:[#allocation8 + $0x448] ss:$16 sps:$4 sm:$0xff]  }
 0x438   :  { %3876 = vmatpush1.bf16.msra.mxu0 %v4935_v62  ;;  %4040 = vmatpush1.bf16.msra.mxu1 %v4938_v57  ;;  %v5024_v62 = vld [vmem:[#allocation8 + $0x46c] ss:$16 sps:$4 sm:$0xff]   ;;  %v5019_v57 = vld [vmem:[#allocation8 + $0x460] ss:$16 sps:$4 sm:$0xff]  }
 0x439   :  { %3877 = vmatprep.subr.bf16.mxu0 %v4943_v63  ;;  %4041 = vmatprep.subr.bf16.mxu1 %v4946_v0  ;;  %v5022_v63 = vld [vmem:[#allocation8 + $0x468] ss:$16 sps:$4 sm:$0xff]   ;;  %v5027_v0 = vld [vmem:[#allocation8 + $0x484] ss:$16 sps:$4 sm:$0xff]  }
 0x43c   :  { %3878 = vmatpush1.bf16.msra.mxu0 %v4941_v1  ;;  %4042 = vmatpush1.bf16.msra.mxu1 %v4944_v2  ;;  %v5030_v1 = vld [vmem:[#allocation8 + $0x48c] ss:$16 sps:$4 sm:$0xff]   ;;  %v5025_v2 = vld [vmem:[#allocation8 + $0x480] ss:$16 sps:$4 sm:$0xff]  }
 0x43d   :  { %3879 = vmatprep.subr.bf16.mxu0 %v4949_v4  ;;  %4043 = vmatprep.subr.bf16.mxu1 %v4952_v35  ;;  %v5028_v4 = vld [vmem:[#allocation8 + $0x488] ss:$16 sps:$4 sm:$0xff]   ;;  %v5033_v35 = vld [vmem:[#allocation8 + $0x4a4] ss:$16 sps:$4 sm:$0xff]  }
 0x440   :  { %3880 = vmatpush1.bf16.msra.mxu0 %v4947_v59  ;;  %4044 = vmatpush1.bf16.msra.mxu1 %v4950_v5  ;;  %v5036_v59 = vld [vmem:[#allocation8 + $0x4ac] ss:$16 sps:$4 sm:$0xff]   ;;  %v5031_v5 = vld [vmem:[#allocation8 + $0x4a0] ss:$16 sps:$4 sm:$0xff]  }
 0x441   :  { %3881 = vmatprep.subr.bf16.mxu0 %v4955_v15  ;;  %4045 = vmatprep.subr.bf16.mxu1 %v4958_v6  ;;  %v5034_v15 = vld [vmem:[#allocation8 + $0x4a8] ss:$16 sps:$4 sm:$0xff]   ;;  %v5039_v6 = vld [vmem:[#allocation8 + $0x4c4] ss:$16 sps:$4 sm:$0xff]  }
 0x444   :  { %3882 = vmatpush1.bf16.msra.mxu0 %v4953_v7  ;;  %4046 = vmatpush1.bf16.msra.mxu1 %v4956_v8  ;;  %v5042_v7 = vld [vmem:[#allocation8 + $0x4cc] ss:$16 sps:$4 sm:$0xff]   ;;  %v5037_v8 = vld [vmem:[#allocation8 + $0x4c0] ss:$16 sps:$4 sm:$0xff]  }
 0x445   :  { %3883 = vmatprep.subr.bf16.mxu0 %v4961_v10  ;;  %4047 = vmatprep.subr.bf16.mxu1 %v4964_v11  ;;  %v5040_v10 = vld [vmem:[#allocation8 + $0x4c8] ss:$16 sps:$4 sm:$0xff]   ;;  %v5045_v11 = vld [vmem:[#allocation8 + $0x4e4] ss:$16 sps:$4 sm:$0xff]  }
 0x448   :  { %3884 = vmatpush1.bf16.msra.mxu0 %v4959_v12  ;;  %4048 = vmatpush1.bf16.msra.mxu1 %v4962_v24  ;;  %v5048_v12 = vld [vmem:[#allocation8 + $0x4ec] ss:$16 sps:$4 sm:$0xff]   ;;  %v5043_v24 = vld [vmem:[#allocation8 + $0x4e0] ss:$16 sps:$4 sm:$0xff]  }
 0x449   :  { %3885 = vmatprep.subr.bf16.mxu0 %v4967_v18  ;;  %4049 = vmatprep.subr.bf16.mxu1 %v4970_v13  ;;  %v5046_v18 = vld [vmem:[#allocation8 + $0x4e8] ss:$16 sps:$4 sm:$0xff]   ;;  %v5051_v13 = vld [vmem:[#allocation8 + $0x504] ss:$16 sps:$4 sm:$0xff]  }
 0x44c   :  { %3886 = vmatpush1.bf16.msra.mxu0 %v4965_v42  ;;  %4050 = vmatpush1.bf16.msra.mxu1 %v4968_v43  ;;  %v5054_v42 = vld [vmem:[#allocation8 + $0x50c] ss:$16 sps:$4 sm:$0xff]   ;;  %v5049_v43 = vld [vmem:[#allocation8 + $0x500] ss:$16 sps:$4 sm:$0xff]  }
 0x44d   :  { %3887 = vmatprep.subr.bf16.mxu0 %v4973_v49  ;;  %4051 = vmatprep.subr.bf16.mxu1 %v4976_v16  ;;  %v5052_v49 = vld [vmem:[#allocation8 + $0x508] ss:$16 sps:$4 sm:$0xff]   ;;  %v5057_v16 = vld [vmem:[#allocation8 + $0x524] ss:$16 sps:$4 sm:$0xff]  }
 0x450   :  { %3888 = vmatpush1.bf16.msra.mxu0 %v4971_v19  ;;  %4052 = vmatpush1.bf16.msra.mxu1 %v4974_v20  ;;  %v5060_v19 = vld [vmem:[#allocation8 + $0x52c] ss:$16 sps:$4 sm:$0xff]   ;;  %v5055_v20 = vld [vmem:[#allocation8 + $0x520] ss:$16 sps:$4 sm:$0xff]  }
 0x451   :  { %3889 = vmatprep.subr.bf16.mxu0 %v4979_v21  ;;  %4053 = vmatprep.subr.bf16.mxu1 %v4982_v23  ;;  %v5058_v21 = vld [vmem:[#allocation8 + $0x528] ss:$16 sps:$4 sm:$0xff]   ;;  %v5063_v23 = vld [vmem:[#allocation8 + $0x544] ss:$16 sps:$4 sm:$0xff]  }
 0x454   :  { %3890 = vmatpush1.bf16.msra.mxu0 %v4977_v26  ;;  %4054 = vmatpush1.bf16.msra.mxu1 %v4980_v30  ;;  %v5066_v26 = vld [vmem:[#allocation8 + $0x54c] ss:$16 sps:$4 sm:$0xff]   ;;  %v5061_v30 = vld [vmem:[#allocation8 + $0x540] ss:$16 sps:$4 sm:$0xff]  }
 0x455   :  { %3891 = vmatprep.subr.bf16.mxu0 %v4985_v31  ;;  %4055 = vmatprep.subr.bf16.mxu1 %v4988_v33  ;;  %v5064_v31 = vld [vmem:[#allocation8 + $0x548] ss:$16 sps:$4 sm:$0xff]   ;;  %v5069_v33 = vld [vmem:[#allocation8 + $0x564] ss:$16 sps:$4 sm:$0xff]  }
 0x458   :  { %3892 = vmatpush1.bf16.msra.mxu0 %v4983_v17  ;;  %4056 = vmatpush1.bf16.msra.mxu1 %v4986_v36  ;;  %v5072_v17 = vld [vmem:[#allocation8 + $0x56c] ss:$16 sps:$4 sm:$0xff]   ;;  %v5067_v36 = vld [vmem:[#allocation8 + $0x560] ss:$16 sps:$4 sm:$0xff]  }
 0x459   :  { %3893 = vmatprep.subr.bf16.mxu0 %v4991_v41  ;;  %4057 = vmatprep.subr.bf16.mxu1 %v4994_v37  ;;  %v5070_v41 = vld [vmem:[#allocation8 + $0x568] ss:$16 sps:$4 sm:$0xff]   ;;  %v5075_v37 = vld [vmem:[#allocation8 + $0x584] ss:$16 sps:$4 sm:$0xff]  }
 0x45c   :  { %3894 = vmatpush1.bf16.msra.mxu0 %v4989_v22  ;;  %4058 = vmatpush1.bf16.msra.mxu1 %v4992_v32  ;;  %v5078_v22 = vld [vmem:[#allocation8 + $0x58c] ss:$16 sps:$4 sm:$0xff]   ;;  %v5073_v32 = vld [vmem:[#allocation8 + $0x580] ss:$16 sps:$4 sm:$0xff]  }
 0x45d   :  { %3895 = vmatprep.subr.bf16.mxu0 %v4997_v38  ;;  %4059 = vmatprep.subr.bf16.mxu1 %v5000_v39  ;;  %v5076_v38 = vld [vmem:[#allocation8 + $0x588] ss:$16 sps:$4 sm:$0xff]   ;;  %v5081_v39 = vld [vmem:[#allocation8 + $0x5a4] ss:$16 sps:$4 sm:$0xff]  }
 0x460   :  { %3896 = vmatpush1.bf16.msra.mxu0 %v4995_v40  ;;  %4060 = vmatpush1.bf16.msra.mxu1 %v4998_v44  ;;  %v5084_v40 = vld [vmem:[#allocation8 + $0x5ac] ss:$16 sps:$4 sm:$0xff]   ;;  %v5079_v44 = vld [vmem:[#allocation8 + $0x5a0] ss:$16 sps:$4 sm:$0xff]  }
 0x461   :  { %3906 = vmatprep.subr.bf16.mxu0 %v5003_v45  ;;  %4070 = vmatprep.subr.bf16.mxu1 %v5006_v46  ;;  %v5082_v45 = vld [vmem:[#allocation8 + $0x5a8] ss:$16 sps:$4 sm:$0xff]   ;;  %v5087_v46 = vld [vmem:[#allocation8 + $0x5c4] ss:$16 sps:$4 sm:$0xff]  }
 0x463   :  { %3898 = vmatmul.mubr.bf16.vlgmr.msra.gmra.mrb[12].mxu0 %v2260_v47  ;;  %4062 = vmatmul.mubr.bf16.vlgmr.msra.gmra.mrb[12].mxu1 %v2260_v47  ;;  %v5085_v47 = vld [vmem:[#allocation8 + $0x5c0] ss:$16 sps:$4 sm:$0xff]  }
 0x464   :  { %3907 = vmatpush1.bf16.msra.mxu0 %v5001_v9  ;;  %3938 = vmatprep.mubr.bf16.mxu0 %v2263_v50  ;;  %v5090_v9 = vld [vmem:[#allocation8 + $0x5cc] ss:$16 sps:$4 sm:$0xff]  }
 0x465   :  { %4071 = vmatpush1.bf16.msra.mxu1 %v5004_v48  ;;  %4102 = vmatprep.mubr.bf16.mxu1 %v2263_v50  ;;  %v5088_v48 = vld [vmem:[#allocation8 + $0x5c8] ss:$16 sps:$4 sm:$0xff]   ;;  %v5093_v50 = vld [vmem:[#allocation8 + $0x5e4] ss:$16 sps:$4 sm:$0xff]  }
 0x466   :  { %3908 = vmatprep.subr.bf16.mxu0 %v5009_v53  ;;  %4072 = vmatprep.subr.bf16.mxu1 %v5012_v54  ;;  %v5096_v53 = vld [vmem:[#allocation8 + $0x5ec] ss:$16 sps:$4 sm:$0xff]   ;;  %v5091_v54 = vld [vmem:[#allocation8 + $0x5e0] ss:$16 sps:$4 sm:$0xff]  }
 0x468   :  { %3909 = vmatpush1.bf16.msra.mxu0 %v5007_v55  ;;  %v5094_v55 = vld [vmem:[#allocation8 + $0x5e8] ss:$16 sps:$4 sm:$0xff]  }
 0x469   :  { %4073 = vmatpush1.bf16.msra.mxu1 %v5010_v14  ;;  %3910 = vmatprep.subr.bf16.mxu0 %v5015_v56  ;;  %v5099_v14 = vld [vmem:[#allocation8 + $0x604] ss:$16 sps:$4 sm:$0xff]   ;;  %v5102_v56 = vld [vmem:[#allocation8 + $0x60c] ss:$16 sps:$4 sm:$0xff]  }
 0x46a   :  { %4074 = vmatprep.subr.bf16.mxu1 %v5018_v34  ;;  %v5097_v34 = vld [vmem:[#allocation8 + $0x600] ss:$16 sps:$4 sm:$0xff]  }
 0x46c   :  { %3911 = vmatpush1.bf16.msra.mxu0 %v5013_v58  ;;  %v2262_v58 = vpack.c.bf16 %v5551_v51, %v5551_v51  ;;  %v5109_v51 = vld [vmem:[#allocation8 + $0x640] ss:$16 sps:$4 sm:$0xff]  }
 0x46d   :  { %4075 = vmatpush1.bf16.msra.mxu1 %v5016_v61  ;;  %3912 = vmatprep.subr.bf16.mxu0 %v5021_v52  ;;  %v5100_v61 = vld [vmem:[#allocation8 + $0x608] ss:$16 sps:$4 sm:$0xff]   ;;  %v5105_v52 = vld [vmem:[#allocation8 + $0x624] ss:$16 sps:$4 sm:$0xff]  }
 0x46e   :  { %4076 = vmatprep.subr.bf16.mxu1 %v5024_v62  ;;  %v2265_v62 = vpack.c.bf16 %v5553_v3, %v5553_v3  ;;  %v5120_v3 = vld [vmem:[#allocation8 + $0x66c] ss:$16 sps:$4 sm:$0xff]  }
 0x470   :  { %3913 = vmatpush1.bf16.msra.mxu0 %v5019_v57  ;;  %v5108_v57 = vld [vmem:[#allocation8 + $0x62c] ss:$16 sps:$4 sm:$0xff]  }
 0x471   :  { %4077 = vmatpush1.bf16.msra.mxu1 %v5022_v63  ;;  %3914 = vmatprep.subr.bf16.mxu0 %v5027_v0  ;;  %v5103_v63 = vld [vmem:[#allocation8 + $0x620] ss:$16 sps:$4 sm:$0xff]   ;;  %v5106_v0 = vld [vmem:[#allocation8 + $0x628] ss:$16 sps:$4 sm:$0xff]  }
 0x472   :  { %4078 = vmatprep.subr.bf16.mxu1 %v5030_v1  ;;  %v5111_v1 = vld [vmem:[#allocation8 + $0x644] ss:$16 sps:$4 sm:$0xff]  }
 0x474   :  { %3915 = vmatpush1.bf16.msra.mxu0 %v5025_v2  ;;  %v5114_v2 = vld [vmem:[#allocation8 + $0x64c] ss:$16 sps:$4 sm:$0xff]  }
 0x475   :  { %4079 = vmatpush1.bf16.msra.mxu1 %v5028_v4  ;;  %3916 = vmatprep.subr.bf16.mxu0 %v5033_v35  ;;  %v5112_v4 = vld [vmem:[#allocation8 + $0x648] ss:$16 sps:$4 sm:$0xff]   ;;  %v5117_v35 = vld [vmem:[#allocation8 + $0x664] ss:$16 sps:$4 sm:$0xff]  }
 0x476   :  { %4080 = vmatprep.subr.bf16.mxu1 %v5036_v59  ;;  %v5115_v59 = vld [vmem:[#allocation8 + $0x660] ss:$16 sps:$4 sm:$0xff]  }
 0x478   :  { %3917 = vmatpush1.bf16.msra.mxu0 %v5031_v5  ;;  %v5118_v5 = vld [vmem:[#allocation8 + $0x668] ss:$16 sps:$4 sm:$0xff]  }
 0x479   :  { %4081 = vmatpush1.bf16.msra.mxu1 %v5034_v15  ;;  %3918 = vmatprep.subr.bf16.mxu0 %v5039_v6  ;;  %v5123_v15 = vld [vmem:[#allocation8 + $0x684] ss:$16 sps:$4 sm:$0xff]   ;;  %v5126_v6 = vld [vmem:[#allocation8 + $0x68c] ss:$16 sps:$4 sm:$0xff]  }
 0x47a   :  { %4082 = vmatprep.subr.bf16.mxu1 %v5042_v7  ;;  %v5121_v7 = vld [vmem:[#allocation8 + $0x680] ss:$16 sps:$4 sm:$0xff]  }
 0x47c   :  { %3919 = vmatpush1.bf16.msra.mxu0 %v5037_v8  ;;  %v5124_v8 = vld [vmem:[#allocation8 + $0x688] ss:$16 sps:$4 sm:$0xff]  }
 0x47d   :  { %4083 = vmatpush1.bf16.msra.mxu1 %v5040_v10  ;;  %3920 = vmatprep.subr.bf16.mxu0 %v5045_v11  ;;  %v5129_v10 = vld [vmem:[#allocation8 + $0x6a4] ss:$16 sps:$4 sm:$0xff]   ;;  %v5132_v11 = vld [vmem:[#allocation8 + $0x6ac] ss:$16 sps:$4 sm:$0xff]  }
 0x47e   :  { %4084 = vmatprep.subr.bf16.mxu1 %v5048_v12  ;;  %v5127_v12 = vld [vmem:[#allocation8 + $0x6a0] ss:$16 sps:$4 sm:$0xff]  }
 0x480   :  { %3921 = vmatpush1.bf16.msra.mxu0 %v5043_v24  ;;  %v5130_v24 = vld [vmem:[#allocation8 + $0x6a8] ss:$16 sps:$4 sm:$0xff]  }
 0x481   :  { %4085 = vmatpush1.bf16.msra.mxu1 %v5046_v18  ;;  %3922 = vmatprep.subr.bf16.mxu0 %v5051_v13  ;;  %v5135_v18 = vld [vmem:[#allocation8 + $0x6c4] ss:$16 sps:$4 sm:$0xff]   ;;  %v5138_v13 = vld [vmem:[#allocation8 + $0x6cc] ss:$16 sps:$4 sm:$0xff]  }
 0x482   :  { %4086 = vmatprep.subr.bf16.mxu1 %v5054_v42  ;;  %v5133_v42 = vld [vmem:[#allocation8 + $0x6c0] ss:$16 sps:$4 sm:$0xff]  }
 0x484   :  { %3923 = vmatpush1.bf16.msra.mxu0 %v5049_v43  ;;  %v5136_v43 = vld [vmem:[#allocation8 + $0x6c8] ss:$16 sps:$4 sm:$0xff]  }
 0x485   :  { %4087 = vmatpush1.bf16.msra.mxu1 %v5052_v49  ;;  %3924 = vmatprep.subr.bf16.mxu0 %v5057_v16  ;;  %v5141_v49 = vld [vmem:[#allocation8 + $0x6e4] ss:$16 sps:$4 sm:$0xff]   ;;  %v5144_v16 = vld [vmem:[#allocation8 + $0x6ec] ss:$16 sps:$4 sm:$0xff]  }
 0x486   :  { %4088 = vmatprep.subr.bf16.mxu1 %v5060_v19  ;;  %v5139_v19 = vld [vmem:[#allocation8 + $0x6e0] ss:$16 sps:$4 sm:$0xff]  }
 0x488   :  { %3925 = vmatpush1.bf16.msra.mxu0 %v5055_v20  ;;  %v5142_v20 = vld [vmem:[#allocation8 + $0x6e8] ss:$16 sps:$4 sm:$0xff]  }
 0x489   :  { %4089 = vmatpush1.bf16.msra.mxu1 %v5058_v21  ;;  %3926 = vmatprep.subr.bf16.mxu0 %v5063_v23  ;;  %v5147_v21 = vld [vmem:[#allocation8 + $0x704] ss:$16 sps:$4 sm:$0xff]   ;;  %v5150_v23 = vld [vmem:[#allocation8 + $0x70c] ss:$16 sps:$4 sm:$0xff]  }
 0x48a   :  { %4090 = vmatprep.subr.bf16.mxu1 %v5066_v26  ;;  %v5145_v26 = vld [vmem:[#allocation8 + $0x700] ss:$16 sps:$4 sm:$0xff]  }
 0x48c   :  { %3927 = vmatpush1.bf16.msra.mxu0 %v5061_v30  ;;  %v5148_v30 = vld [vmem:[#allocation8 + $0x708] ss:$16 sps:$4 sm:$0xff]  }
 0x48d   :  { %4091 = vmatpush1.bf16.msra.mxu1 %v5064_v31  ;;  %3928 = vmatprep.subr.bf16.mxu0 %v5069_v33  ;;  %v5153_v31 = vld [vmem:[#allocation8 + $0x724] ss:$16 sps:$4 sm:$0xff]   ;;  %v5156_v33 = vld [vmem:[#allocation8 + $0x72c] ss:$16 sps:$4 sm:$0xff]  }
 0x48e   :  { %4092 = vmatprep.subr.bf16.mxu1 %v5072_v17  ;;  %v5151_v17 = vld [vmem:[#allocation8 + $0x720] ss:$16 sps:$4 sm:$0xff]  }
 0x490   :  { %3929 = vmatpush1.bf16.msra.mxu0 %v5067_v36  ;;  %v5154_v36 = vld [vmem:[#allocation8 + $0x728] ss:$16 sps:$4 sm:$0xff]  }
 0x491   :  { %4093 = vmatpush1.bf16.msra.mxu1 %v5070_v41  ;;  %3930 = vmatprep.subr.bf16.mxu0 %v5075_v37  ;;  %v5159_v41 = vld [vmem:[#allocation8 + $0x744] ss:$16 sps:$4 sm:$0xff]   ;;  %v5162_v37 = vld [vmem:[#allocation8 + $0x74c] ss:$16 sps:$4 sm:$0xff]  }
 0x492   :  { %4094 = vmatprep.subr.bf16.mxu1 %v5078_v22  ;;  %v5157_v22 = vld [vmem:[#allocation8 + $0x740] ss:$16 sps:$4 sm:$0xff]  }
 0x494   :  { %3931 = vmatpush1.bf16.msra.mxu0 %v5073_v32  ;;  %v5160_v32 = vld [vmem:[#allocation8 + $0x748] ss:$16 sps:$4 sm:$0xff]  }
 0x495   :  { %4095 = vmatpush1.bf16.msra.mxu1 %v5076_v38  ;;  %3932 = vmatprep.subr.bf16.mxu0 %v5081_v39  ;;  %v5165_v38 = vld [vmem:[#allocation8 + $0x764] ss:$16 sps:$4 sm:$0xff]   ;;  %v5168_v39 = vld [vmem:[#allocation8 + $0x76c] ss:$16 sps:$4 sm:$0xff]  }
 0x496   :  { %4096 = vmatprep.subr.bf16.mxu1 %v5084_v40  ;;  %v5163_v40 = vld [vmem:[#allocation8 + $0x760] ss:$16 sps:$4 sm:$0xff]  }
 0x498   :  { %3933 = vmatpush1.bf16.msra.mxu0 %v5079_v44  ;;  %v5166_v44 = vld [vmem:[#allocation8 + $0x768] ss:$16 sps:$4 sm:$0xff]  }
 0x499   :  { %4097 = vmatpush1.bf16.msra.mxu1 %v5082_v45  ;;  %3934 = vmatprep.subr.bf16.mxu0 %v5087_v46  ;;  %v5171_v45 = vld [vmem:[#allocation8 + $0x784] ss:$16 sps:$4 sm:$0xff]   ;;  %v5174_v46 = vld [vmem:[#allocation8 + $0x78c] ss:$16 sps:$4 sm:$0xff]  }
 0x49a   :  { %4098 = vmatprep.subr.bf16.mxu1 %v5090_v9  ;;  %v5169_v9 = vld [vmem:[#allocation8 + $0x780] ss:$16 sps:$4 sm:$0xff]  }
 0x49c   :  { %3935 = vmatpush1.bf16.msra.mxu0 %v5085_v47  ;;  %v5172_v47 = vld [vmem:[#allocation8 + $0x788] ss:$16 sps:$4 sm:$0xff]  }
 0x49d   :  { %4099 = vmatpush1.bf16.msra.mxu1 %v5088_v48  ;;  %3936 = vmatprep.subr.bf16.mxu0 %v5093_v50  ;;  %v5177_v48 = vld [vmem:[#allocation8 + $0x7a4] ss:$16 sps:$4 sm:$0xff]   ;;  %v5180_v50 = vld [vmem:[#allocation8 + $0x7ac] ss:$16 sps:$4 sm:$0xff]  }
 0x49e   :  { %4100 = vmatprep.subr.bf16.mxu1 %v5096_v53  ;;  %v5175_v53 = vld [vmem:[#allocation8 + $0x7a0] ss:$16 sps:$4 sm:$0xff]  }
 0x4a0   :  { %3937 = vmatpush1.bf16.msra.mxu0 %v5091_v54  ;;  %v5178_v54 = vld [vmem:[#allocation8 + $0x7a8] ss:$16 sps:$4 sm:$0xff]  }
 0x4a1   :  { %4101 = vmatpush1.bf16.msra.mxu1 %v5094_v55  ;;  %3947 = vmatprep.subr.bf16.mxu0 %v5099_v14  ;;  %v5183_v55 = vld [vmem:[#allocation8 + $0x7c4] ss:$16 sps:$4 sm:$0xff]   ;;  %v5186_v14 = vld [vmem:[#allocation8 + $0x7cc] ss:$16 sps:$4 sm:$0xff]  }
 0x4a2   :  { %4111 = vmatprep.subr.bf16.mxu1 %v5102_v56  ;;  %v5181_v56 = vld [vmem:[#allocation8 + $0x7c0] ss:$16 sps:$4 sm:$0xff]  }
 0x4a3   :  { %3939 = vmatmul.mubr.bf16.vlgmr.msra.gmra.mrb[12].mxu0 %v2262_v58 }
 0x4a4   :  { %4103 = vmatmul.mubr.bf16.vlgmr.msra.gmra.mrb[12].mxu1 %v2262_v58  ;;  %3948 = vmatpush1.bf16.msra.mxu0 %v5097_v34  ;;  %v5184_v34 = vld [vmem:[#allocation8 + $0x7c8] ss:$16 sps:$4 sm:$0xff]   ;;  %v5189_v58 = vld [vmem:[#allocation8 + $0x7e4] ss:$16 sps:$4 sm:$0xff]  }
 0x4a5   :  { %3979 = vmatprep.mubr.bf16.mxu0 %v2265_v62  ;;  %4112 = vmatpush1.bf16.msra.mxu1 %v5100_v61  ;;  %v5192_v61 = vld [vmem:[#allocation8 + $0x7ec] ss:$16 sps:$4 sm:$0xff]  }
 0x4a6   :  { %4143 = vmatprep.mubr.bf16.mxu1 %v2265_v62  ;;  %3949 = vmatprep.subr.bf16.mxu0 %v5105_v52  ;;  %v5187_v52 = vld [vmem:[#allocation8 + $0x7e0] ss:$16 sps:$4 sm:$0xff]   ;;  %v5190_v62 = vld [vmem:[#allocation8 + $0x7e8] ss:$16 sps:$4 sm:$0xff]  }
 0x4a7   :  { %4113 = vmatprep.subr.bf16.mxu1 %v5108_v57  ;;  %v2264_v57 = vpack.c.bf16 %v5555_v60, %v5555_v60 }
 0x4a8   :  { %3950 = vmatpush1.bf16.msra.mxu0 %v5103_v63  ;;  %v2522_v63 = vld [vmem:[%s5590_s6] sm:$0xf] }
 0x4a9   :  { %4114 = vmatpush1.bf16.msra.mxu1 %v5106_v0  ;;  %3951 = vmatprep.subr.bf16.mxu0 %v5111_v1  ;;  %v2527_v0 = vrot.slane %v2522_v63, %v5406_v25  ;;  %v2535_v1 = vrot.slane %v2522_v63, %v5415_v28 }
 0x4aa   :  { %4115 = vmatprep.subr.bf16.mxu1 %v5114_v2  ;;  %v2531_v2 = vrot.slane %v2522_v63, %v5412_v27 }
 0x4ac   :  { %3952 = vmatpush1.bf16.msra.mxu0 %v5109_v51  ;;  %v2539_v51 = vrot.slane %v2522_v63, %v5418_v29 }
 0x4ad   :  { %4116 = vmatpush1.bf16.msra.mxu1 %v5112_v4  ;;  %3953 = vmatprep.subr.bf16.mxu0 %v5117_v35 }
 0x4ae   :  { %4117 = vmatprep.subr.bf16.mxu1 %v5120_v3 }
 0x4b0   :  { %3954 = vmatpush1.bf16.msra.mxu0 %v5115_v59 }
 0x4b1   :  { %4118 = vmatpush1.bf16.msra.mxu1 %v5118_v5  ;;  %3955 = vmatprep.subr.bf16.mxu0 %v5123_v15 }
 0x4b2   :  { %4119 = vmatprep.subr.bf16.mxu1 %v5126_v6 }
 0x4b4   :  { %3956 = vmatpush1.bf16.msra.mxu0 %v5121_v7 }
 0x4b5   :  { %4120 = vmatpush1.bf16.msra.mxu1 %v5124_v8  ;;  %3957 = vmatprep.subr.bf16.mxu0 %v5129_v10 }
 0x4b6   :  { %4121 = vmatprep.subr.bf16.mxu1 %v5132_v11 }
 0x4b8   :  { %3958 = vmatpush1.bf16.msra.mxu0 %v5127_v12 }
 0x4b9   :  { %4122 = vmatpush1.bf16.msra.mxu1 %v5130_v24  ;;  %3959 = vmatprep.subr.bf16.mxu0 %v5135_v18 }
 0x4ba   :  { %4123 = vmatprep.subr.bf16.mxu1 %v5138_v13 }
 0x4bc   :  { %3960 = vmatpush1.bf16.msra.mxu0 %v5133_v42 }
 0x4bd   :  { %4124 = vmatpush1.bf16.msra.mxu1 %v5136_v43  ;;  %3961 = vmatprep.subr.bf16.mxu0 %v5141_v49 }
 0x4be   :  { %4125 = vmatprep.subr.bf16.mxu1 %v5144_v16 }
 0x4c0   :  { %3962 = vmatpush1.bf16.msra.mxu0 %v5139_v19 }
 0x4c1   :  { %4126 = vmatpush1.bf16.msra.mxu1 %v5142_v20  ;;  %3963 = vmatprep.subr.bf16.mxu0 %v5147_v21 }
 0x4c2   :  { %4127 = vmatprep.subr.bf16.mxu1 %v5150_v23 }
 0x4c4   :  { %3964 = vmatpush1.bf16.msra.mxu0 %v5145_v26 }
 0x4c5   :  { %4128 = vmatpush1.bf16.msra.mxu1 %v5148_v30  ;;  %3965 = vmatprep.subr.bf16.mxu0 %v5153_v31 }
 0x4c6   :  { %4129 = vmatprep.subr.bf16.mxu1 %v5156_v33 }
 0x4c8   :  { %3966 = vmatpush1.bf16.msra.mxu0 %v5151_v17 }
 0x4c9   :  { %4130 = vmatpush1.bf16.msra.mxu1 %v5154_v36  ;;  %3967 = vmatprep.subr.bf16.mxu0 %v5159_v41 }
 0x4ca   :  { %4131 = vmatprep.subr.bf16.mxu1 %v5162_v37 }
 0x4cc   :  { %3968 = vmatpush1.bf16.msra.mxu0 %v5157_v22 }
 0x4cd   :  { %4132 = vmatpush1.bf16.msra.mxu1 %v5160_v32  ;;  %3969 = vmatprep.subr.bf16.mxu0 %v5165_v38  ;;  %v4185_v38 = vld [vmem:[%s5591_s7] sm:$0xf] }
 0x4ce   :  { %4133 = vmatprep.subr.bf16.mxu1 %v5168_v39  ;;  %v4190_v39 = vrot.slane %v4185_v38, %v5406_v25 }
 0x4d0   :  { %3970 = vmatpush1.bf16.msra.mxu0 %v5163_v40 }
 0x4d1   :  { %4134 = vmatpush1.bf16.msra.mxu1 %v5166_v44  ;;  %3971 = vmatprep.subr.bf16.mxu0 %v5171_v45 }
 0x4d2   :  { %4135 = vmatprep.subr.bf16.mxu1 %v5174_v46  ;;  %v4194_v46 = vrot.slane %v4185_v38, %v5412_v27 }
 0x4d4   :  { %3972 = vmatpush1.bf16.msra.mxu0 %v5169_v9 }
 0x4d5   :  { %4136 = vmatpush1.bf16.msra.mxu1 %v5172_v47  ;;  %3973 = vmatprep.subr.bf16.mxu0 %v5177_v48  ;;  %v4198_v47 = vrot.slane %v4185_v38, %v5415_v28 }
 0x4d6   :  { %4137 = vmatprep.subr.bf16.mxu1 %v5180_v50 }
 0x4d8   :  { %3974 = vmatpush1.bf16.msra.mxu0 %v5175_v53 }
 0x4d9   :  { %4138 = vmatpush1.bf16.msra.mxu1 %v5178_v54  ;;  %3975 = vmatprep.subr.bf16.mxu0 %v5183_v55 }
 0x4da   :  { %4139 = vmatprep.subr.bf16.mxu1 %v5186_v14  ;;  %v4202_v14 = vrot.slane %v4185_v38, %v5418_v29 }
 0x4dc   :  { %3976 = vmatpush1.bf16.msra.mxu0 %v5181_v56 }
 0x4dd   :  { %4140 = vmatpush1.bf16.msra.mxu1 %v5184_v34  ;;  %3977 = vmatprep.subr.bf16.mxu0 %v5189_v58 }
 0x4de   :  { %4141 = vmatprep.subr.bf16.mxu1 %v5192_v61 }
 0x4e0   :  { %3978 = vmatpush1.bf16.msra.mxu0 %v5187_v52 }
 0x4e1   :  { %4142 = vmatpush1.bf16.msra.mxu1 %v5190_v62 }
 0x4e3   :  { %3980 = vmatmul.mubr.bf16.vlgmr.msra.gmra.mrb[12].mxu0 %v2264_v57 }
 0x4e4   :  { %4144 = vmatmul.mubr.bf16.vlgmr.msra.gmra.mrb[12].mxu1 %v2264_v57  ;;  %v4747_v57 = vld [vmem:[#allocation2] ss:$0 sm:$0xff] }
 0x5b6   :  { %v3981_v4 = vpop.f32.mrb[12].mxu0 }
 0x5b7   :  { %v4756_v35 = vadd.f32 %v3981_v4, %v2527_v0  ;;  %v4145_v3 = vpop.f32.mrb[12].mxu1  ;;  %v3983_v59 = vpop.f32.mrb[13].mxu0 }
 0x5b8   :  { %v4758_v5 = vadd.f32 %v4145_v3, %v2535_v1  ;;  %v4757_v60 = vadd.f32 %v3983_v59, %v2531_v2  ;;  %v4147_v15 = vpop.f32.mrb[13].mxu1  ;;  %v3985_v6 = vpop.f32.mrb[14].mxu0 }
 0x5b9   :  { %v4152_v7 = vmax.f32 %v4756_v35, 0.0  ;;  %v4759_v8 = vadd.f32 %v4147_v15, %v2539_v51  ;;  %v4149_v10 = vpop.f32.mrb[14].mxu1  ;;  %v3986_v11 = vpop.f32.mrb[15].mxu0 }
 0x5ba   :  { %v4154_v12 = vmax.f32 %v4758_v5, 0.0  ;;  %v4153_v24 = vmax.f32 %v4757_v60, 0.0  ;;  %v4150_v18 = vpop.f32.mrb[15].mxu1 }
 0x5bb   :  { %v4162_v13 = vmul.f32 %v4152_v7, %v4152_v7  ;;  %v4155_v43 = vmax.f32 %v4759_v8, 0.0 }
 0x5bc   :  { %v4163_v42 = vmul.f32 %v4153_v24, %v4153_v24  ;;  %v4156_v49 = vadd.f32 %v4153_v24, %v4152_v7  ;;  %v4164_v19 = vmul.f32 %v4154_v12, %v4154_v12 }
 0x5bd   :  { %v4165_v23 = vmul.f32 %v4155_v43, %v4155_v43 }
 0x5be   :  { %v4157_v16 = vadd.f32 %v4156_v49, %v4154_v12  ;;  %v4166_v20 = vadd.f32 %v4163_v42, %v4162_v13 }
 0x5c0   :  { %v4158_v21 = vadd.f32 %v4157_v16, %v4155_v43  ;;  %v4167_v26 = vadd.f32 %v4166_v20, %v4164_v19 }
 0x5c2   :  { %4159 = vadd.xlane.f32.xlu0 %v4158_v21  ;;  %v4168_v30 = vadd.f32 %v4167_v26, %v4165_v23 }
 0x5c4   :  { %4169 = vadd.xlane.f32.xlu1 %v4168_v30 }
 0x64f   :  { %v4160_v31 = vpop.xlane.xlu0 %4159 }
 0x650   :  { %v4161_v33 = vmul.f32 0.001953125, %v4160_v31 }
 0x651   :  { %v4170_v17 = vpop.xlane.xlu1 %4169 }
 0x652   :  { %v4171_v36 = vmul.f32 0.001953125, %v4170_v17  ;;  %v4172_v41 = vmul.f32 %v4161_v33, %v4161_v33  ;;  %v4175_v40 = vsub.f32 %v4152_v7, %v4161_v33  ;;  %v4176_v44 = vsub.f32 %v4153_v24, %v4161_v33 }
 0x653   :  { %v4177_v45 = vsub.f32 %v4154_v12, %v4161_v33  ;;  %v4178_v48 = vsub.f32 %v4155_v43, %v4161_v33 }
 0x654   :  { %v4173_v37 = vsub.f32 %v4171_v36, %v4172_v41 }
 0x656   :  { %v4174_v22 = vmax.f32 %v4173_v37, 0.0 }
 0x658   :  { %v4179_v32 = vadd.f32 1e-05, %v4174_v22 }
 0x65a   :  { %5197 = vrsqrt.f32 %v4179_v32 }
 0x664   :  { %v5198_v9 = vpop.eup %5197 }
 0x665   :  { %v4181_v50 = vmul.f32 %v5198_v9, %v4175_v40  ;;  %v4182_v53 = vmul.f32 %v5198_v9, %v4176_v44  ;;  %v4183_v54 = vmul.f32 %v5198_v9, %v4177_v45  ;;  %v4184_v55 = vmul.f32 %v5198_v9, %v4178_v48 }
 0x667   :  { %v4207_v56 = vmul.f32 %v4190_v39, %v4181_v50  ;;  %v4208_v34 = vmul.f32 %v4194_v46, %v4182_v53  ;;  %v4209_v58 = vmul.f32 %v4198_v47, %v4183_v54  ;;  %v4210_v25 = vmul.f32 %v4202_v14, %v4184_v55 }
 0x669   :  { %v4211_v61 = vadd.f32 %v4208_v34, %v4207_v56 }
 0x66b   :  { %v4212_v52 = vadd.f32 %v4211_v61, %v4209_v58 }
 0x66d   :  { %v4213_v62 = vadd.f32 %v4212_v52, %v4210_v25 }
 0x66f   :  { %4214 = vadd.xlane.f32.xlu0 %v4213_v62 }
 0x6fc   :  { %v4215_v27 = vpop.xlane.xlu0 %4214 }
 0x6fd   :  { %v4223_v63 = vadd.f32 %v4747_v57, %v4215_v27 }
 0x6ff   :  { %4225 = vst.msk [vmem:[%s5593_s9] sm:$0xff] %vm4224_vm1, %v4223_v63 }
 0x700   :  { %4230 = vsyncpa [#allocation4], 1 }
 0x701   :  { %4231 = vsyncpa [#allocation6], 1 }
 0x702   :  { %4232 = vsyncpa [#allocation9], 1 }

</bundles_post_ra>
